<compile_context>
chip_gen: v6e
topology: v6e:2x2x1
jax: 0.10.0
libtpu: 0.0.40
codegen_flags: <defaults>
</compile_context>

<pallas_src>
import functools

import jax
import jax.numpy as jnp
import numpy as np
from jax.experimental import pallas as pl
from jax.experimental.pallas import tpu as pltpu

LN_EPS = 1e-5
_INV_SQRT2 = 0.7071067811865476


def _layernorm(x, w, b):
    mean = jnp.mean(x, axis=-1, keepdims=True)
    var = jnp.mean((x - mean) ** 2, axis=-1, keepdims=True)
    return (x - mean) * jax.lax.rsqrt(var + LN_EPS) * w + b


# ---------------------------------------------------------------------------
# Fused kernel: one grid step == one batch element, all layers in-kernel.
# ---------------------------------------------------------------------------
def transformer_kernel(x_ref,
                       ln1w_ref, ln1b_ref, wqkv_ref, wo_ref, bo_ref,
                       ln2w_ref, ln2b_ref, w1_ref, b1_ref, w2_ref, b2_ref,
                       o_ref, *, depth, heads, scale):
    """x_ref: (1, N, D).  Weight refs carry a leading `depth` axis:
         wqkv_ref: (depth, 3*heads, D, dh)   head-major Q|K|V projection
         wo_ref:   (depth, heads, dh, D)     head-major output projection
    """
    x = x_ref[0].astype(jnp.float32)                              # (N, D)
    n_tok, dim = x.shape

    for l in range(depth):                                        # static unroll
        # ---------------- PreNorm -> Attention -> residual ----------------
        ln = _layernorm(x, ln1w_ref[l], ln1b_ref[l])              # (N, D)

        # One batched matmul produces Q, K, V for every head (batch = 3*heads).
        ln_b = jnp.broadcast_to(ln[None], (3 * heads, n_tok, dim))
        qkv = jnp.einsum('hnd,hde->hne', ln_b, wqkv_ref[l],
                         preferred_element_type=jnp.float32)      # (3H, N, dh)
        q = qkv[:heads]                                           # leading-axis
        k = qkv[heads:2 * heads]                                  # slices: free
        v = qkv[2 * heads:]

        dots = jnp.einsum('hnd,hmd->hnm', q, k,
                          preferred_element_type=jnp.float32) * scale
        m = jnp.max(dots, axis=-1, keepdims=True)
        p = jnp.exp(dots - m)
        p = p * pl.reciprocal(jnp.sum(p, axis=-1, keepdims=True), approx=True)

        head_out = jnp.einsum('hnm,hmd->hnd', p, v,
                              preferred_element_type=jnp.float32)  # (H, N, dh)
        # Output projection for all heads as one batched matmul + cheap reduce.
        proj = jnp.einsum('hne,hed->hnd', head_out, wo_ref[l],
                          preferred_element_type=jnp.float32)      # (H, N, D)
        x = jnp.sum(proj, axis=0) + bo_ref[l] + x                  # bias+residual

        # ---------------- PreNorm -> FeedForward -> residual --------------
        ln = _layernorm(x, ln2w_ref[l], ln2b_ref[l])
        h = jnp.dot(ln, w1_ref[l], preferred_element_type=jnp.float32) + b1_ref[l]
        h = 0.5 * h * (1.0 + jax.lax.erf(h * _INV_SQRT2))          # exact GELU
        x = jnp.dot(h, w2_ref[l], preferred_element_type=jnp.float32) + b2_ref[l] + x

    o_ref[0] = x.astype(o_ref.dtype)


# ---------------------------------------------------------------------------
# pallas_call wrapper
# ---------------------------------------------------------------------------
_PACKED_ORDER = ("ln1_w", "ln1_b", "w_qkv_h", "w_out_h", "b_out",
                 "ln2_w", "ln2_b", "w1", "b1", "w2", "b2")


def _invariant_spec(arr):
    zeros = (0,) * arr.ndim
    return pl.BlockSpec(arr.shape, lambda b, _z=zeros: _z)


def transformer_forward(x, packed, heads, dim_head):
    B, N, D = x.shape
    depth = packed["w_qkv_h"].shape[0]
    kernel = functools.partial(transformer_kernel, depth=depth, heads=heads,
                               scale=dim_head ** -0.5)
    weights = [packed[k] for k in _PACKED_ORDER]
    return pl.pallas_call(
        kernel,
        out_shape=jax.ShapeDtypeStruct((B, N, D), x.dtype),
        grid=(B,),
        in_specs=[pl.BlockSpec((1, N, D), lambda b: (b, 0, 0))]
                 + [_invariant_spec(w) for w in weights],
        out_specs=pl.BlockSpec((1, N, D), lambda b: (b, 0, 0)),
        compiler_params=pltpu.CompilerParams(
            dimension_semantics=("parallel",)),
    )(x, *weights)


# ---------------------------------------------------------------------------
# Parameter init (natural PyTorch-like layout) and packing for the kernel
# ---------------------------------------------------------------------------
def init_params(key, dim, depth, heads, dim_head, mlp_dim):
    inner = heads * dim_head
    layers = []
    for _ in range(depth):
        key, k0, k1, k2, k3 = jax.random.split(key, 5)
        attn = {
            "ln_w": jnp.ones((1, dim), jnp.float32),
            "ln_b": jnp.zeros((1, dim), jnp.float32),
            "w_qkv": 0.05 * jax.random.normal(k0, (dim, 3 * inner), jnp.float32),
            "w_out": 0.05 * jax.random.normal(k1, (inner, dim), jnp.float32),
            "b_out": jnp.zeros((1, dim), jnp.float32),
        }
        ff = {
            "ln_w": jnp.ones((1, dim), jnp.float32),
            "ln_b": jnp.zeros((1, dim), jnp.float32),
            "w1": 0.05 * jax.random.normal(k2, (dim, mlp_dim), jnp.float32),
            "b1": jnp.zeros((1, mlp_dim), jnp.float32),
            "w2": 0.05 * jax.random.normal(k3, (mlp_dim, dim), jnp.float32),
            "b2": jnp.zeros((1, dim), jnp.float32),
        }
        layers.append({"attn": attn, "ff": ff})
    return layers


def pack_params(layers, heads, dim_head):
    """Stack per-layer params along a leading depth axis and re-layout the
    attention weights head-major (done once on the host; free for the kernel)."""
    def per_layer(lp):
        a, f = lp["attn"], lp["ff"]
        D = a["w_qkv"].shape[0]
        # (D, 3*inner) -> (D, 3, heads, dh) -> (3*heads, D, dh), Q|K|V head-major
        wqkv_h = a["w_qkv"].reshape(D, 3, heads, dim_head).transpose(1, 2, 0, 3)
        wqkv_h = wqkv_h.reshape(3 * heads, D, dim_head)
        wo_h = a["w_out"].reshape(heads, dim_head, D)
        return dict(
            ln1_w=a["ln_w"], ln1_b=a["ln_b"],
            w_qkv_h=wqkv_h, w_out_h=wo_h, b_out=a["b_out"],
            ln2_w=f["ln_w"], ln2_b=f["ln_b"],
            w1=f["w1"], b1=f["b1"], w2=f["w2"], b2=f["b2"],
        )

    per = [per_layer(lp) for lp in layers]
    return {k: jnp.stack([p[k] for p in per], axis=0) for k in per[0]}


# ---------------------------------------------------------------------------
# Pure-JAX reference (mirrors the PyTorch forward) for a correctness check
# ---------------------------------------------------------------------------
def ref_forward(x, layers, heads, dim_head):
    scale = dim_head ** -0.5
    B, N, D = x.shape
    inner = heads * dim_head
    for lp in layers:
        a = lp["attn"]
        ln = _layernorm(x, a["ln_w"], a["ln_b"])
        qkv = ln @ a["w_qkv"]
        q, k, v = jnp.split(qkv, 3, axis=-1)
        split = lambda t: t.reshape(B, N, heads, dim_head).transpose(0, 2, 1, 3)
        q, k, v = split(q), split(k), split(v)
        dots = jnp.einsum("bhnd,bhmd->bhnm", q, k) * scale
        attn = jax.nn.softmax(dots, axis=-1)
        out = jnp.einsum("bhnm,bhmd->bhnd", attn, v)
        out = out.transpose(0, 2, 1, 3).reshape(B, N, inner)
        x = out @ a["w_out"] + a["b_out"] + x

        f = lp["ff"]
        ln = _layernorm(x, f["ln_w"], f["ln_b"])
        h = ln @ f["w1"] + f["b1"]
        h = 0.5 * h * (1.0 + jax.lax.erf(h * _INV_SQRT2))
        x = h @ f["w2"] + f["b2"] + x
    return x


if __name__ == "__main__":
    # Small config: dim=32, depth=2, heads=4, dim_head=8, mlp_dim=64
    dim, depth, heads, dim_head, mlp_dim = 32, 2, 4, 8, 64
    B, N = 2, 8

    key = jax.random.PRNGKey(0)
    kx, kp = jax.random.split(key)
    x = jax.random.normal(kx, (B, N, dim), jnp.float32)
    layers = init_params(kp, dim, depth, heads, dim_head, mlp_dim)
    packed = pack_params(layers, heads, dim_head)

    out = transformer_forward(x, packed, heads, dim_head)
    out = jax.block_until_ready(out)

    ref = ref_forward(x, layers, heads, dim_head)
    # Tolerance accounts for pl.reciprocal(approx=True) in the softmax denom.
    np.testing.assert_allclose(np.asarray(out), np.asarray(ref),
                               atol=1e-3, rtol=1e-3)
    print("KERNEL_OK")
</pallas_src>

<mosaic_0001>
module attributes {stable_mosaic.version = 11 : i64} {
  func.func @transformer_kernel(%arg0: i32, %arg1: memref<1x8x32xf32, #tpu.memory_space<vmem>>, %arg2: memref<2x1x32xf32, #tpu.memory_space<vmem>>, %arg3: memref<2x1x32xf32, #tpu.memory_space<vmem>>, %arg4: memref<2x12x32x8xf32, #tpu.memory_space<vmem>>, %arg5: memref<2x4x8x32xf32, #tpu.memory_space<vmem>>, %arg6: memref<2x1x32xf32, #tpu.memory_space<vmem>>, %arg7: memref<2x1x32xf32, #tpu.memory_space<vmem>>, %arg8: memref<2x1x32xf32, #tpu.memory_space<vmem>>, %arg9: memref<2x32x64xf32, #tpu.memory_space<vmem>>, %arg10: memref<2x1x64xf32, #tpu.memory_space<vmem>>, %arg11: memref<2x64x32xf32, #tpu.memory_space<vmem>>, %arg12: memref<2x1x32xf32, #tpu.memory_space<vmem>>, %arg13: memref<1x8x32xf32, #tpu.memory_space<vmem>>) attributes {dimension_semantics = [#tpu.dimension_semantics<parallel>], iteration_bounds = array<i64: 2>, scalar_prefetch = 0 : i64, scratch_operands = 0 : i64, tpu.core_type = #tpu.core_type<tc>, window_params = [{transform_indices = @transform_0, window_bounds = array<i64: 1, 8, 32>}, {pipeline_mode = #tpu.pipeline_mode<synchronous>, transform_indices = @transform_1, window_bounds = array<i64: 2, 1, 32>}, {pipeline_mode = #tpu.pipeline_mode<synchronous>, transform_indices = @transform_2, window_bounds = array<i64: 2, 1, 32>}, {pipeline_mode = #tpu.pipeline_mode<synchronous>, transform_indices = @transform_3, window_bounds = array<i64: 2, 12, 32, 8>}, {pipeline_mode = #tpu.pipeline_mode<synchronous>, transform_indices = @transform_4, window_bounds = array<i64: 2, 4, 8, 32>}, {pipeline_mode = #tpu.pipeline_mode<synchronous>, transform_indices = @transform_5, window_bounds = array<i64: 2, 1, 32>}, {pipeline_mode = #tpu.pipeline_mode<synchronous>, transform_indices = @transform_6, window_bounds = array<i64: 2, 1, 32>}, {pipeline_mode = #tpu.pipeline_mode<synchronous>, transform_indices = @transform_7, window_bounds = array<i64: 2, 1, 32>}, {pipeline_mode = #tpu.pipeline_mode<synchronous>, transform_indices = @transform_8, window_bounds = array<i64: 2, 32, 64>}, {pipeline_mode = #tpu.pipeline_mode<synchronous>, transform_indices = @transform_9, window_bounds = array<i64: 2, 1, 64>}, {pipeline_mode = #tpu.pipeline_mode<synchronous>, transform_indices = @transform_10, window_bounds = array<i64: 2, 64, 32>}, {pipeline_mode = #tpu.pipeline_mode<synchronous>, transform_indices = @transform_11, window_bounds = array<i64: 2, 1, 32>}, {transform_indices = @transform_12, window_bounds = array<i64: 1, 8, 32>}]} {
    %c0 = arith.constant 0 : index
    %c0_0 = arith.constant 0 : index
    %c0_1 = arith.constant 0 : index
    %0 = vector.load %arg1[%c0, %c0_0, %c0_1] : memref<1x8x32xf32, #tpu.memory_space<vmem>>, vector<1x8x32xf32>
    %1 = vector.shape_cast %0 : vector<1x8x32xf32> to vector<8x32xf32>
    %c0_2 = arith.constant 0 : index
    %c0_3 = arith.constant 0 : index
    %c0_4 = arith.constant 0 : index
    %2 = vector.load %arg2[%c0_2, %c0_3, %c0_4] : memref<2x1x32xf32, #tpu.memory_space<vmem>>, vector<1x1x32xf32>
    %3 = vector.shape_cast %2 : vector<1x1x32xf32> to vector<1x32xf32>
    %c0_5 = arith.constant 0 : index
    %c0_6 = arith.constant 0 : index
    %c0_7 = arith.constant 0 : index
    %4 = vector.load %arg3[%c0_5, %c0_6, %c0_7] : memref<2x1x32xf32, #tpu.memory_space<vmem>>, vector<1x1x32xf32>
    %5 = vector.shape_cast %4 : vector<1x1x32xf32> to vector<1x32xf32>
    %cst = arith.constant dense<0.000000e+00> : vector<8xf32>
    %6 = vector.multi_reduction <add>, %1, %cst [1] : vector<8x32xf32> to vector<8xf32>
    %7 = vector.shape_cast %6 : vector<8xf32> to vector<8x1xf32>
    %cst_8 = arith.constant 3.200000e+01 : f32
    %8 = vector.broadcast %cst_8 : f32 to vector<8x1xf32>
    %9 = arith.divf %7, %8 : vector<8x1xf32>
    %10 = vector.broadcast %9 : vector<8x1xf32> to vector<8x32xf32>
    %11 = arith.subf %1, %10 : vector<8x32xf32>
    %12 = arith.mulf %11, %11 : vector<8x32xf32>
    %cst_9 = arith.constant dense<0.000000e+00> : vector<8xf32>
    %13 = vector.multi_reduction <add>, %12, %cst_9 [1] : vector<8x32xf32> to vector<8xf32>
    %14 = vector.shape_cast %13 : vector<8xf32> to vector<8x1xf32>
    %cst_10 = arith.constant 3.200000e+01 : f32
    %15 = vector.broadcast %cst_10 : f32 to vector<8x1xf32>
    %16 = arith.divf %14, %15 : vector<8x1xf32>
    %17 = vector.broadcast %9 : vector<8x1xf32> to vector<8x32xf32>
    %18 = arith.subf %1, %17 : vector<8x32xf32>
    %cst_11 = arith.constant 9.99999974E-6 : f32
    %19 = vector.broadcast %cst_11 : f32 to vector<8x1xf32>
    %20 = arith.addf %16, %19 : vector<8x1xf32>
    %21 = math.rsqrt %20 : vector<8x1xf32>
    %22 = vector.broadcast %21 : vector<8x1xf32> to vector<8x32xf32>
    %23 = arith.mulf %18, %22 : vector<8x32xf32>
    %24 = vector.broadcast %3 : vector<1x32xf32> to vector<8x32xf32>
    %25 = arith.mulf %23, %24 : vector<8x32xf32>
    %26 = vector.broadcast %5 : vector<1x32xf32> to vector<8x32xf32>
    %27 = arith.addf %25, %26 : vector<8x32xf32>
    %28 = vector.shape_cast %27 : vector<8x32xf32> to vector<1x8x32xf32>
    %29 = vector.shape_cast %28 : vector<1x8x32xf32> to vector<1x8x32xf32>
    %30 = vector.broadcast %29 : vector<1x8x32xf32> to vector<12x8x32xf32>
    %c0_12 = arith.constant 0 : index
    %c0_13 = arith.constant 0 : index
    %c0_14 = arith.constant 0 : index
    %c0_15 = arith.constant 0 : index
    %31 = vector.load %arg4[%c0_12, %c0_13, %c0_14, %c0_15] : memref<2x12x32x8xf32, #tpu.memory_space<vmem>>, vector<1x12x32x8xf32>
    %32 = vector.shape_cast %31 : vector<1x12x32x8xf32> to vector<12x32x8xf32>
    "tpu.trace_start"() <{level = 10 : i32, message = "hnd,hde->hne"}> : () -> ()
    %cst_16 = arith.constant dense<0.000000e+00> : vector<12x8x8xf32>
    %33 = tpu.matmul %30, %32, %cst_16 {dimension_numbers = #tpu.dot_dimension_numbers<[2], [1], [1], [2], [0, 0, 0, 1, 1, 2], [0], [0]>} : vector<12x8x32xf32>, vector<12x32x8xf32>, vector<12x8x8xf32> -> vector<12x8x8xf32>
    "tpu.trace_stop"() : () -> ()
    %34 = vector.extract_strided_slice %33 {offsets = [0, 0, 0], sizes = [4, 8, 8], strides = [1, 1, 1]} : vector<12x8x8xf32> to vector<4x8x8xf32>
    %35 = vector.extract_strided_slice %33 {offsets = [4, 0, 0], sizes = [4, 8, 8], strides = [1, 1, 1]} : vector<12x8x8xf32> to vector<4x8x8xf32>
    %36 = vector.extract_strided_slice %33 {offsets = [8, 0, 0], sizes = [4, 8, 8], strides = [1, 1, 1]} : vector<12x8x8xf32> to vector<4x8x8xf32>
    "tpu.trace_start"() <{level = 10 : i32, message = "hnd,hmd->hnm"}> : () -> ()
    %cst_17 = arith.constant dense<0.000000e+00> : vector<4x8x8xf32>
    %37 = tpu.matmul %34, %35, %cst_17 {dimension_numbers = #tpu.dot_dimension_numbers<[2], [2], [1], [1], [0, 0, 0, 1, 1, 1], [0], [0]>} : vector<4x8x8xf32>, vector<4x8x8xf32>, vector<4x8x8xf32> -> vector<4x8x8xf32>
    "tpu.trace_stop"() : () -> ()
    %cst_18 = arith.constant 0.353553385 : f32
    %38 = vector.broadcast %cst_18 : f32 to vector<4x8x8xf32>
    %39 = arith.mulf %37, %38 : vector<4x8x8xf32>
    %cst_19 = arith.constant dense<0xFF800000> : vector<4x8xf32>
    %40 = vector.multi_reduction <maximumf>, %39, %cst_19 [2] : vector<4x8x8xf32> to vector<4x8xf32>
    %41 = vector.shape_cast %40 : vector<4x8xf32> to vector<4x8x1xf32>
    %42 = vector.broadcast %41 : vector<4x8x1xf32> to vector<4x8x8xf32>
    %43 = arith.subf %39, %42 : vector<4x8x8xf32>
    %44 = math.exp %43 : vector<4x8x8xf32>
    %cst_20 = arith.constant dense<0.000000e+00> : vector<4x8xf32>
    %45 = vector.multi_reduction <add>, %44, %cst_20 [2] : vector<4x8x8xf32> to vector<4x8xf32>
    %46 = vector.shape_cast %45 : vector<4x8xf32> to vector<4x8x1xf32>
    %47 = tpu.reciprocal %46 {approx = true} : vector<4x8x1xf32> -> vector<4x8x1xf32>
    %48 = vector.broadcast %47 : vector<4x8x1xf32> to vector<4x8x8xf32>
    %49 = arith.mulf %44, %48 : vector<4x8x8xf32>
    "tpu.trace_start"() <{level = 10 : i32, message = "hnm,hmd->hnd"}> : () -> ()
    %cst_21 = arith.constant dense<0.000000e+00> : vector<4x8x8xf32>
    %50 = tpu.matmul %49, %36, %cst_21 {dimension_numbers = #tpu.dot_dimension_numbers<[2], [1], [1], [2], [0, 0, 0, 1, 1, 2], [0], [0]>} : vector<4x8x8xf32>, vector<4x8x8xf32>, vector<4x8x8xf32> -> vector<4x8x8xf32>
    "tpu.trace_stop"() : () -> ()
    %c0_22 = arith.constant 0 : index
    %c0_23 = arith.constant 0 : index
    %c0_24 = arith.constant 0 : index
    %c0_25 = arith.constant 0 : index
    %51 = vector.load %arg5[%c0_22, %c0_23, %c0_24, %c0_25] : memref<2x4x8x32xf32, #tpu.memory_space<vmem>>, vector<1x4x8x32xf32>
    %52 = vector.shape_cast %51 : vector<1x4x8x32xf32> to vector<4x8x32xf32>
    "tpu.trace_start"() <{level = 10 : i32, message = "hne,hed->hnd"}> : () -> ()
    %cst_26 = arith.constant dense<0.000000e+00> : vector<4x8x32xf32>
    %53 = tpu.matmul %50, %52, %cst_26 {dimension_numbers = #tpu.dot_dimension_numbers<[2], [1], [1], [2], [0, 0, 0, 1, 1, 2], [0], [0]>} : vector<4x8x8xf32>, vector<4x8x32xf32>, vector<4x8x32xf32> -> vector<4x8x32xf32>
    "tpu.trace_stop"() : () -> ()
    %cst_27 = arith.constant dense<0.000000e+00> : vector<8x32xf32>
    %54 = vector.multi_reduction <add>, %53, %cst_27 [0] : vector<4x8x32xf32> to vector<8x32xf32>
    %c0_28 = arith.constant 0 : index
    %c0_29 = arith.constant 0 : index
    %c0_30 = arith.constant 0 : index
    %55 = vector.load %arg6[%c0_28, %c0_29, %c0_30] : memref<2x1x32xf32, #tpu.memory_space<vmem>>, vector<1x1x32xf32>
    %56 = vector.shape_cast %55 : vector<1x1x32xf32> to vector<1x32xf32>
    %57 = vector.broadcast %56 : vector<1x32xf32> to vector<8x32xf32>
    %58 = arith.addf %54, %57 : vector<8x32xf32>
    %59 = arith.addf %58, %1 : vector<8x32xf32>
    %c0_31 = arith.constant 0 : index
    %c0_32 = arith.constant 0 : index
    %c0_33 = arith.constant 0 : index
    %60 = vector.load %arg7[%c0_31, %c0_32, %c0_33] : memref<2x1x32xf32, #tpu.memory_space<vmem>>, vector<1x1x32xf32>
    %61 = vector.shape_cast %60 : vector<1x1x32xf32> to vector<1x32xf32>
    %c0_34 = arith.constant 0 : index
    %c0_35 = arith.constant 0 : index
    %c0_36 = arith.constant 0 : index
    %62 = vector.load %arg8[%c0_34, %c0_35, %c0_36] : memref<2x1x32xf32, #tpu.memory_space<vmem>>, vector<1x1x32xf32>
    %63 = vector.shape_cast %62 : vector<1x1x32xf32> to vector<1x32xf32>
    %cst_37 = arith.constant dense<0.000000e+00> : vector<8xf32>
    %64 = vector.multi_reduction <add>, %59, %cst_37 [1] : vector<8x32xf32> to vector<8xf32>
    %65 = vector.shape_cast %64 : vector<8xf32> to vector<8x1xf32>
    %cst_38 = arith.constant 3.200000e+01 : f32
    %66 = vector.broadcast %cst_38 : f32 to vector<8x1xf32>
    %67 = arith.divf %65, %66 : vector<8x1xf32>
    %68 = vector.broadcast %67 : vector<8x1xf32> to vector<8x32xf32>
    %69 = arith.subf %59, %68 : vector<8x32xf32>
    %70 = arith.mulf %69, %69 : vector<8x32xf32>
    %cst_39 = arith.constant dense<0.000000e+00> : vector<8xf32>
    %71 = vector.multi_reduction <add>, %70, %cst_39 [1] : vector<8x32xf32> to vector<8xf32>
    %72 = vector.shape_cast %71 : vector<8xf32> to vector<8x1xf32>
    %cst_40 = arith.constant 3.200000e+01 : f32
    %73 = vector.broadcast %cst_40 : f32 to vector<8x1xf32>
    %74 = arith.divf %72, %73 : vector<8x1xf32>
    %75 = vector.broadcast %67 : vector<8x1xf32> to vector<8x32xf32>
    %76 = arith.subf %59, %75 : vector<8x32xf32>
    %cst_41 = arith.constant 9.99999974E-6 : f32
    %77 = vector.broadcast %cst_41 : f32 to vector<8x1xf32>
    %78 = arith.addf %74, %77 : vector<8x1xf32>
    %79 = math.rsqrt %78 : vector<8x1xf32>
    %80 = vector.broadcast %79 : vector<8x1xf32> to vector<8x32xf32>
    %81 = arith.mulf %76, %80 : vector<8x32xf32>
    %82 = vector.broadcast %61 : vector<1x32xf32> to vector<8x32xf32>
    %83 = arith.mulf %81, %82 : vector<8x32xf32>
    %84 = vector.broadcast %63 : vector<1x32xf32> to vector<8x32xf32>
    %85 = arith.addf %83, %84 : vector<8x32xf32>
    %c0_42 = arith.constant 0 : index
    %c0_43 = arith.constant 0 : index
    %c0_44 = arith.constant 0 : index
    %86 = vector.load %arg9[%c0_42, %c0_43, %c0_44] : memref<2x32x64xf32, #tpu.memory_space<vmem>>, vector<1x32x64xf32>
    %87 = vector.shape_cast %86 : vector<1x32x64xf32> to vector<32x64xf32>
    %cst_45 = arith.constant dense<0.000000e+00> : vector<8x64xf32>
    %88 = tpu.matmul %85, %87, %cst_45 {dimension_numbers = #tpu.dot_dimension_numbers<[1], [0], [0], [1], [0, 0, 1, 1], [], []>} : vector<8x32xf32>, vector<32x64xf32>, vector<8x64xf32> -> vector<8x64xf32>
    %c0_46 = arith.constant 0 : index
    %c0_47 = arith.constant 0 : index
    %c0_48 = arith.constant 0 : index
    %89 = vector.load %arg10[%c0_46, %c0_47, %c0_48] : memref<2x1x64xf32, #tpu.memory_space<vmem>>, vector<1x1x64xf32>
    %90 = vector.shape_cast %89 : vector<1x1x64xf32> to vector<1x64xf32>
    %91 = vector.broadcast %90 : vector<1x64xf32> to vector<8x64xf32>
    %92 = arith.addf %88, %91 : vector<8x64xf32>
    %cst_49 = arith.constant 5.000000e-01 : f32
    %93 = vector.broadcast %cst_49 : f32 to vector<8x64xf32>
    %94 = arith.mulf %93, %92 : vector<8x64xf32>
    %cst_50 = arith.constant 0.707106769 : f32
    %95 = vector.broadcast %cst_50 : f32 to vector<8x64xf32>
    %96 = arith.mulf %92, %95 : vector<8x64xf32>
    %97 = math.erf %96 : vector<8x64xf32>
    %cst_51 = arith.constant 1.000000e+00 : f32
    %98 = vector.broadcast %cst_51 : f32 to vector<8x64xf32>
    %99 = arith.addf %98, %97 : vector<8x64xf32>
    %100 = arith.mulf %94, %99 : vector<8x64xf32>
    %c0_52 = arith.constant 0 : index
    %c0_53 = arith.constant 0 : index
    %c0_54 = arith.constant 0 : index
    %101 = vector.load %arg11[%c0_52, %c0_53, %c0_54] : memref<2x64x32xf32, #tpu.memory_space<vmem>>, vector<1x64x32xf32>
    %102 = vector.shape_cast %101 : vector<1x64x32xf32> to vector<64x32xf32>
    %cst_55 = arith.constant dense<0.000000e+00> : vector<8x32xf32>
    %103 = tpu.matmul %100, %102, %cst_55 {dimension_numbers = #tpu.dot_dimension_numbers<[1], [0], [0], [1], [0, 0, 1, 1], [], []>} : vector<8x64xf32>, vector<64x32xf32>, vector<8x32xf32> -> vector<8x32xf32>
    %c0_56 = arith.constant 0 : index
    %c0_57 = arith.constant 0 : index
    %c0_58 = arith.constant 0 : index
    %104 = vector.load %arg12[%c0_56, %c0_57, %c0_58] : memref<2x1x32xf32, #tpu.memory_space<vmem>>, vector<1x1x32xf32>
    %105 = vector.shape_cast %104 : vector<1x1x32xf32> to vector<1x32xf32>
    %106 = vector.broadcast %105 : vector<1x32xf32> to vector<8x32xf32>
    %107 = arith.addf %103, %106 : vector<8x32xf32>
    %108 = arith.addf %107, %59 : vector<8x32xf32>
    %c1 = arith.constant 1 : index
    %c0_59 = arith.constant 0 : index
    %c0_60 = arith.constant 0 : index
    %109 = vector.load %arg2[%c1, %c0_59, %c0_60] : memref<2x1x32xf32, #tpu.memory_space<vmem>>, vector<1x1x32xf32>
    %110 = vector.shape_cast %109 : vector<1x1x32xf32> to vector<1x32xf32>
    %c1_61 = arith.constant 1 : index
    %c0_62 = arith.constant 0 : index
    %c0_63 = arith.constant 0 : index
    %111 = vector.load %arg3[%c1_61, %c0_62, %c0_63] : memref<2x1x32xf32, #tpu.memory_space<vmem>>, vector<1x1x32xf32>
    %112 = vector.shape_cast %111 : vector<1x1x32xf32> to vector<1x32xf32>
    %cst_64 = arith.constant dense<0.000000e+00> : vector<8xf32>
    %113 = vector.multi_reduction <add>, %108, %cst_64 [1] : vector<8x32xf32> to vector<8xf32>
    %114 = vector.shape_cast %113 : vector<8xf32> to vector<8x1xf32>
    %cst_65 = arith.constant 3.200000e+01 : f32
    %115 = vector.broadcast %cst_65 : f32 to vector<8x1xf32>
    %116 = arith.divf %114, %115 : vector<8x1xf32>
    %117 = vector.broadcast %116 : vector<8x1xf32> to vector<8x32xf32>
    %118 = arith.subf %108, %117 : vector<8x32xf32>
    %119 = arith.mulf %118, %118 : vector<8x32xf32>
    %cst_66 = arith.constant dense<0.000000e+00> : vector<8xf32>
    %120 = vector.multi_reduction <add>, %119, %cst_66 [1] : vector<8x32xf32> to vector<8xf32>
    %121 = vector.shape_cast %120 : vector<8xf32> to vector<8x1xf32>
    %cst_67 = arith.constant 3.200000e+01 : f32
    %122 = vector.broadcast %cst_67 : f32 to vector<8x1xf32>
    %123 = arith.divf %121, %122 : vector<8x1xf32>
    %124 = vector.broadcast %116 : vector<8x1xf32> to vector<8x32xf32>
    %125 = arith.subf %108, %124 : vector<8x32xf32>
    %cst_68 = arith.constant 9.99999974E-6 : f32
    %126 = vector.broadcast %cst_68 : f32 to vector<8x1xf32>
    %127 = arith.addf %123, %126 : vector<8x1xf32>
    %128 = math.rsqrt %127 : vector<8x1xf32>
    %129 = vector.broadcast %128 : vector<8x1xf32> to vector<8x32xf32>
    %130 = arith.mulf %125, %129 : vector<8x32xf32>
    %131 = vector.broadcast %110 : vector<1x32xf32> to vector<8x32xf32>
    %132 = arith.mulf %130, %131 : vector<8x32xf32>
    %133 = vector.broadcast %112 : vector<1x32xf32> to vector<8x32xf32>
    %134 = arith.addf %132, %133 : vector<8x32xf32>
    %135 = vector.shape_cast %134 : vector<8x32xf32> to vector<1x8x32xf32>
    %136 = vector.shape_cast %135 : vector<1x8x32xf32> to vector<1x8x32xf32>
    %137 = vector.broadcast %136 : vector<1x8x32xf32> to vector<12x8x32xf32>
    %c1_69 = arith.constant 1 : index
    %c0_70 = arith.constant 0 : index
    %c0_71 = arith.constant 0 : index
    %c0_72 = arith.constant 0 : index
    %138 = vector.load %arg4[%c1_69, %c0_70, %c0_71, %c0_72] : memref<2x12x32x8xf32, #tpu.memory_space<vmem>>, vector<1x12x32x8xf32>
    %139 = vector.shape_cast %138 : vector<1x12x32x8xf32> to vector<12x32x8xf32>
    "tpu.trace_start"() <{level = 10 : i32, message = "hnd,hde->hne"}> : () -> ()
    %cst_73 = arith.constant dense<0.000000e+00> : vector<12x8x8xf32>
    %140 = tpu.matmul %137, %139, %cst_73 {dimension_numbers = #tpu.dot_dimension_numbers<[2], [1], [1], [2], [0, 0, 0, 1, 1, 2], [0], [0]>} : vector<12x8x32xf32>, vector<12x32x8xf32>, vector<12x8x8xf32> -> vector<12x8x8xf32>
    "tpu.trace_stop"() : () -> ()
    %141 = vector.extract_strided_slice %140 {offsets = [0, 0, 0], sizes = [4, 8, 8], strides = [1, 1, 1]} : vector<12x8x8xf32> to vector<4x8x8xf32>
    %142 = vector.extract_strided_slice %140 {offsets = [4, 0, 0], sizes = [4, 8, 8], strides = [1, 1, 1]} : vector<12x8x8xf32> to vector<4x8x8xf32>
    %143 = vector.extract_strided_slice %140 {offsets = [8, 0, 0], sizes = [4, 8, 8], strides = [1, 1, 1]} : vector<12x8x8xf32> to vector<4x8x8xf32>
    "tpu.trace_start"() <{level = 10 : i32, message = "hnd,hmd->hnm"}> : () -> ()
    %cst_74 = arith.constant dense<0.000000e+00> : vector<4x8x8xf32>
    %144 = tpu.matmul %141, %142, %cst_74 {dimension_numbers = #tpu.dot_dimension_numbers<[2], [2], [1], [1], [0, 0, 0, 1, 1, 1], [0], [0]>} : vector<4x8x8xf32>, vector<4x8x8xf32>, vector<4x8x8xf32> -> vector<4x8x8xf32>
    "tpu.trace_stop"() : () -> ()
    %cst_75 = arith.constant 0.353553385 : f32
    %145 = vector.broadcast %cst_75 : f32 to vector<4x8x8xf32>
    %146 = arith.mulf %144, %145 : vector<4x8x8xf32>
    %cst_76 = arith.constant dense<0xFF800000> : vector<4x8xf32>
    %147 = vector.multi_reduction <maximumf>, %146, %cst_76 [2] : vector<4x8x8xf32> to vector<4x8xf32>
    %148 = vector.shape_cast %147 : vector<4x8xf32> to vector<4x8x1xf32>
    %149 = vector.broadcast %148 : vector<4x8x1xf32> to vector<4x8x8xf32>
    %150 = arith.subf %146, %149 : vector<4x8x8xf32>
    %151 = math.exp %150 : vector<4x8x8xf32>
    %cst_77 = arith.constant dense<0.000000e+00> : vector<4x8xf32>
    %152 = vector.multi_reduction <add>, %151, %cst_77 [2] : vector<4x8x8xf32> to vector<4x8xf32>
    %153 = vector.shape_cast %152 : vector<4x8xf32> to vector<4x8x1xf32>
    %154 = tpu.reciprocal %153 {approx = true} : vector<4x8x1xf32> -> vector<4x8x1xf32>
    %155 = vector.broadcast %154 : vector<4x8x1xf32> to vector<4x8x8xf32>
    %156 = arith.mulf %151, %155 : vector<4x8x8xf32>
    "tpu.trace_start"() <{level = 10 : i32, message = "hnm,hmd->hnd"}> : () -> ()
    %cst_78 = arith.constant dense<0.000000e+00> : vector<4x8x8xf32>
    %157 = tpu.matmul %156, %143, %cst_78 {dimension_numbers = #tpu.dot_dimension_numbers<[2], [1], [1], [2], [0, 0, 0, 1, 1, 2], [0], [0]>} : vector<4x8x8xf32>, vector<4x8x8xf32>, vector<4x8x8xf32> -> vector<4x8x8xf32>
    "tpu.trace_stop"() : () -> ()
    %c1_79 = arith.constant 1 : index
    %c0_80 = arith.constant 0 : index
    %c0_81 = arith.constant 0 : index
    %c0_82 = arith.constant 0 : index
    %158 = vector.load %arg5[%c1_79, %c0_80, %c0_81, %c0_82] : memref<2x4x8x32xf32, #tpu.memory_space<vmem>>, vector<1x4x8x32xf32>
    %159 = vector.shape_cast %158 : vector<1x4x8x32xf32> to vector<4x8x32xf32>
    "tpu.trace_start"() <{level = 10 : i32, message = "hne,hed->hnd"}> : () -> ()
    %cst_83 = arith.constant dense<0.000000e+00> : vector<4x8x32xf32>
    %160 = tpu.matmul %157, %159, %cst_83 {dimension_numbers = #tpu.dot_dimension_numbers<[2], [1], [1], [2], [0, 0, 0, 1, 1, 2], [0], [0]>} : vector<4x8x8xf32>, vector<4x8x32xf32>, vector<4x8x32xf32> -> vector<4x8x32xf32>
    "tpu.trace_stop"() : () -> ()
    %cst_84 = arith.constant dense<0.000000e+00> : vector<8x32xf32>
    %161 = vector.multi_reduction <add>, %160, %cst_84 [0] : vector<4x8x32xf32> to vector<8x32xf32>
    %c1_85 = arith.constant 1 : index
    %c0_86 = arith.constant 0 : index
    %c0_87 = arith.constant 0 : index
    %162 = vector.load %arg6[%c1_85, %c0_86, %c0_87] : memref<2x1x32xf32, #tpu.memory_space<vmem>>, vector<1x1x32xf32>
    %163 = vector.shape_cast %162 : vector<1x1x32xf32> to vector<1x32xf32>
    %164 = vector.broadcast %163 : vector<1x32xf32> to vector<8x32xf32>
    %165 = arith.addf %161, %164 : vector<8x32xf32>
    %166 = arith.addf %165, %108 : vector<8x32xf32>
    %c1_88 = arith.constant 1 : index
    %c0_89 = arith.constant 0 : index
    %c0_90 = arith.constant 0 : index
    %167 = vector.load %arg7[%c1_88, %c0_89, %c0_90] : memref<2x1x32xf32, #tpu.memory_space<vmem>>, vector<1x1x32xf32>
    %168 = vector.shape_cast %167 : vector<1x1x32xf32> to vector<1x32xf32>
    %c1_91 = arith.constant 1 : index
    %c0_92 = arith.constant 0 : index
    %c0_93 = arith.constant 0 : index
    %169 = vector.load %arg8[%c1_91, %c0_92, %c0_93] : memref<2x1x32xf32, #tpu.memory_space<vmem>>, vector<1x1x32xf32>
    %170 = vector.shape_cast %169 : vector<1x1x32xf32> to vector<1x32xf32>
    %cst_94 = arith.constant dense<0.000000e+00> : vector<8xf32>
    %171 = vector.multi_reduction <add>, %166, %cst_94 [1] : vector<8x32xf32> to vector<8xf32>
    %172 = vector.shape_cast %171 : vector<8xf32> to vector<8x1xf32>
    %cst_95 = arith.constant 3.200000e+01 : f32
    %173 = vector.broadcast %cst_95 : f32 to vector<8x1xf32>
    %174 = arith.divf %172, %173 : vector<8x1xf32>
    %175 = vector.broadcast %174 : vector<8x1xf32> to vector<8x32xf32>
    %176 = arith.subf %166, %175 : vector<8x32xf32>
    %177 = arith.mulf %176, %176 : vector<8x32xf32>
    %cst_96 = arith.constant dense<0.000000e+00> : vector<8xf32>
    %178 = vector.multi_reduction <add>, %177, %cst_96 [1] : vector<8x32xf32> to vector<8xf32>
    %179 = vector.shape_cast %178 : vector<8xf32> to vector<8x1xf32>
    %cst_97 = arith.constant 3.200000e+01 : f32
    %180 = vector.broadcast %cst_97 : f32 to vector<8x1xf32>
    %181 = arith.divf %179, %180 : vector<8x1xf32>
    %182 = vector.broadcast %174 : vector<8x1xf32> to vector<8x32xf32>
    %183 = arith.subf %166, %182 : vector<8x32xf32>
    %cst_98 = arith.constant 9.99999974E-6 : f32
    %184 = vector.broadcast %cst_98 : f32 to vector<8x1xf32>
    %185 = arith.addf %181, %184 : vector<8x1xf32>
    %186 = math.rsqrt %185 : vector<8x1xf32>
    %187 = vector.broadcast %186 : vector<8x1xf32> to vector<8x32xf32>
    %188 = arith.mulf %183, %187 : vector<8x32xf32>
    %189 = vector.broadcast %168 : vector<1x32xf32> to vector<8x32xf32>
    %190 = arith.mulf %188, %189 : vector<8x32xf32>
    %191 = vector.broadcast %170 : vector<1x32xf32> to vector<8x32xf32>
    %192 = arith.addf %190, %191 : vector<8x32xf32>
    %c1_99 = arith.constant 1 : index
    %c0_100 = arith.constant 0 : index
    %c0_101 = arith.constant 0 : index
    %193 = vector.load %arg9[%c1_99, %c0_100, %c0_101] : memref<2x32x64xf32, #tpu.memory_space<vmem>>, vector<1x32x64xf32>
    %194 = vector.shape_cast %193 : vector<1x32x64xf32> to vector<32x64xf32>
    %cst_102 = arith.constant dense<0.000000e+00> : vector<8x64xf32>
    %195 = tpu.matmul %192, %194, %cst_102 {dimension_numbers = #tpu.dot_dimension_numbers<[1], [0], [0], [1], [0, 0, 1, 1], [], []>} : vector<8x32xf32>, vector<32x64xf32>, vector<8x64xf32> -> vector<8x64xf32>
    %c1_103 = arith.constant 1 : index
    %c0_104 = arith.constant 0 : index
    %c0_105 = arith.constant 0 : index
    %196 = vector.load %arg10[%c1_103, %c0_104, %c0_105] : memref<2x1x64xf32, #tpu.memory_space<vmem>>, vector<1x1x64xf32>
    %197 = vector.shape_cast %196 : vector<1x1x64xf32> to vector<1x64xf32>
    %198 = vector.broadcast %197 : vector<1x64xf32> to vector<8x64xf32>
    %199 = arith.addf %195, %198 : vector<8x64xf32>
    %cst_106 = arith.constant 5.000000e-01 : f32
    %200 = vector.broadcast %cst_106 : f32 to vector<8x64xf32>
    %201 = arith.mulf %200, %199 : vector<8x64xf32>
    %cst_107 = arith.constant 0.707106769 : f32
    %202 = vector.broadcast %cst_107 : f32 to vector<8x64xf32>
    %203 = arith.mulf %199, %202 : vector<8x64xf32>
    %204 = math.erf %203 : vector<8x64xf32>
    %cst_108 = arith.constant 1.000000e+00 : f32
    %205 = vector.broadcast %cst_108 : f32 to vector<8x64xf32>
    %206 = arith.addf %205, %204 : vector<8x64xf32>
    %207 = arith.mulf %201, %206 : vector<8x64xf32>
    %c1_109 = arith.constant 1 : index
    %c0_110 = arith.constant 0 : index
    %c0_111 = arith.constant 0 : index
    %208 = vector.load %arg11[%c1_109, %c0_110, %c0_111] : memref<2x64x32xf32, #tpu.memory_space<vmem>>, vector<1x64x32xf32>
    %209 = vector.shape_cast %208 : vector<1x64x32xf32> to vector<64x32xf32>
    %cst_112 = arith.constant dense<0.000000e+00> : vector<8x32xf32>
    %210 = tpu.matmul %207, %209, %cst_112 {dimension_numbers = #tpu.dot_dimension_numbers<[1], [0], [0], [1], [0, 0, 1, 1], [], []>} : vector<8x64xf32>, vector<64x32xf32>, vector<8x32xf32> -> vector<8x32xf32>
    %c1_113 = arith.constant 1 : index
    %c0_114 = arith.constant 0 : index
    %c0_115 = arith.constant 0 : index
    %211 = vector.load %arg12[%c1_113, %c0_114, %c0_115] : memref<2x1x32xf32, #tpu.memory_space<vmem>>, vector<1x1x32xf32>
    %212 = vector.shape_cast %211 : vector<1x1x32xf32> to vector<1x32xf32>
    %213 = vector.broadcast %212 : vector<1x32xf32> to vector<8x32xf32>
    %214 = arith.addf %210, %213 : vector<8x32xf32>
    %215 = arith.addf %214, %166 : vector<8x32xf32>
    %c0_116 = arith.constant 0 : index
    %c0_117 = arith.constant 0 : index
    %c0_118 = arith.constant 0 : index
    %216 = vector.load %arg13[%c0_116, %c0_117, %c0_118] : memref<1x8x32xf32, #tpu.memory_space<vmem>>, vector<1x8x32xf32>
    %217 = vector.shape_cast %216 : vector<1x8x32xf32> to vector<8x32xf32>
    %218 = vector.shape_cast %215 : vector<8x32xf32> to vector<1x8x32xf32>
    tpu.vector_store %arg13[%c0_116, %c0_117, %c0_118], %218 {strides = array<i32>} : memref<1x8x32xf32, #tpu.memory_space<vmem>>, vector<1x8x32xf32>,
    return
  }
  func.func @transform_0(%arg0: i32) -> (i32, i32, i32) {
    %c0_i32 = arith.constant 0 : i32
    %c0_i32_0 = arith.constant 0 : i32
    %c0_i32_1 = arith.constant 0 : i32
    return %arg0, %c0_i32, %c0_i32_0 : i32, i32, i32
  }
  func.func @transform_1(%arg0: i32) -> (i32, i32, i32) {
    %c0_i32 = arith.constant 0 : i32
    %c0_i32_0 = arith.constant 0 : i32
    %c0_i32_1 = arith.constant 0 : i32
    %c0_i32_2 = arith.constant 0 : i32
    return %c0_i32, %c0_i32_0, %c0_i32_1 : i32, i32, i32
  }
  func.func @transform_2(%arg0: i32) -> (i32, i32, i32) {
    %c0_i32 = arith.constant 0 : i32
    %c0_i32_0 = arith.constant 0 : i32
    %c0_i32_1 = arith.constant 0 : i32
    %c0_i32_2 = arith.constant 0 : i32
    return %c0_i32, %c0_i32_0, %c0_i32_1 : i32, i32, i32
  }
  func.func @transform_3(%arg0: i32) -> (i32, i32, i32, i32) {
    %c0_i32 = arith.constant 0 : i32
    %c0_i32_0 = arith.constant 0 : i32
    %c0_i32_1 = arith.constant 0 : i32
    %c0_i32_2 = arith.constant 0 : i32
    %c0_i32_3 = arith.constant 0 : i32
    return %c0_i32, %c0_i32_0, %c0_i32_1, %c0_i32_2 : i32, i32, i32, i32
  }
  func.func @transform_4(%arg0: i32) -> (i32, i32, i32, i32) {
    %c0_i32 = arith.constant 0 : i32
    %c0_i32_0 = arith.constant 0 : i32
    %c0_i32_1 = arith.constant 0 : i32
    %c0_i32_2 = arith.constant 0 : i32
    %c0_i32_3 = arith.constant 0 : i32
    return %c0_i32, %c0_i32_0, %c0_i32_1, %c0_i32_2 : i32, i32, i32, i32
  }
  func.func @transform_5(%arg0: i32) -> (i32, i32, i32) {
    %c0_i32 = arith.constant 0 : i32
    %c0_i32_0 = arith.constant 0 : i32
    %c0_i32_1 = arith.constant 0 : i32
    %c0_i32_2 = arith.constant 0 : i32
    return %c0_i32, %c0_i32_0, %c0_i32_1 : i32, i32, i32
  }
  func.func @transform_6(%arg0: i32) -> (i32, i32, i32) {
    %c0_i32 = arith.constant 0 : i32
    %c0_i32_0 = arith.constant 0 : i32
    %c0_i32_1 = arith.constant 0 : i32
    %c0_i32_2 = arith.constant 0 : i32
    return %c0_i32, %c0_i32_0, %c0_i32_1 : i32, i32, i32
  }
  func.func @transform_7(%arg0: i32) -> (i32, i32, i32) {
    %c0_i32 = arith.constant 0 : i32
    %c0_i32_0 = arith.constant 0 : i32
    %c0_i32_1 = arith.constant 0 : i32
    %c0_i32_2 = arith.constant 0 : i32
    return %c0_i32, %c0_i32_0, %c0_i32_1 : i32, i32, i32
  }
  func.func @transform_8(%arg0: i32) -> (i32, i32, i32) {
    %c0_i32 = arith.constant 0 : i32
    %c0_i32_0 = arith.constant 0 : i32
    %c0_i32_1 = arith.constant 0 : i32
    %c0_i32_2 = arith.constant 0 : i32
    return %c0_i32, %c0_i32_0, %c0_i32_1 : i32, i32, i32
  }
  func.func @transform_9(%arg0: i32) -> (i32, i32, i32) {
    %c0_i32 = arith.constant 0 : i32
    %c0_i32_0 = arith.constant 0 : i32
    %c0_i32_1 = arith.constant 0 : i32
    %c0_i32_2 = arith.constant 0 : i32
    return %c0_i32, %c0_i32_0, %c0_i32_1 : i32, i32, i32
  }
  func.func @transform_10(%arg0: i32) -> (i32, i32, i32) {
    %c0_i32 = arith.constant 0 : i32
    %c0_i32_0 = arith.constant 0 : i32
    %c0_i32_1 = arith.constant 0 : i32
    %c0_i32_2 = arith.constant 0 : i32
    return %c0_i32, %c0_i32_0, %c0_i32_1 : i32, i32, i32
  }
  func.func @transform_11(%arg0: i32) -> (i32, i32, i32) {
    %c0_i32 = arith.constant 0 : i32
    %c0_i32_0 = arith.constant 0 : i32
    %c0_i32_1 = arith.constant 0 : i32
    %c0_i32_2 = arith.constant 0 : i32
    return %c0_i32, %c0_i32_0, %c0_i32_1 : i32, i32, i32
  }
  func.func @transform_12(%arg0: i32) -> (i32, i32, i32) {
    %c0_i32 = arith.constant 0 : i32
    %c0_i32_0 = arith.constant 0 : i32
    %c0_i32_1 = arith.constant 0 : i32
    return %arg0, %c0_i32, %c0_i32_0 : i32, i32, i32
  }
}

</mosaic_0001>

<bundles_post_ra>
// kernel: tpu_custom_call.1
= control target key start
LH: loop header
LB: loop body
LE: loop exit
PB: predicated region body
PF: predicated region fallthrough
CT: control target
= control target key end

     0   :  { %s6589_s0 = inlined_call_operand.vmem [shape: f32[2,8,32], index: 0, kind: input, shape index: {}]   ;;  %s6590_s1 = inlined_call_operand.vmem [shape: f32[2,1,32], index: 1, kind: input, shape index: {}]   ;;  %s6591_s2 = inlined_call_operand.vmem [shape: f32[2,1,32], index: 2, kind: input, shape index: {}]   ;;  %s6592_s3 = inlined_call_operand.vmem [shape: f32[2,12,32,8], index: 3, kind: input, shape index: {}]   ;;  %s6593_s4 = inlined_call_operand.vmem [shape: f32[2,4,8,32], index: 4, kind: input, shape index: {}]   ;;  %s6594_s5 = inlined_call_operand.vmem [shape: f32[2,1,32], index: 5, kind: input, shape index: {}]   ;;  %s6595_s6 = inlined_call_operand.vmem [shape: f32[2,1,32], index: 6, kind: input, shape index: {}]   ;;  %s6596_s7 = inlined_call_operand.vmem [shape: f32[2,1,32], index: 7, kind: input, shape index: {}]   ;;  %s6597_s8 = inlined_call_operand.vmem [shape: f32[2,32,64], index: 8, kind: input, shape index: {}]   ;;  %s6598_s9 = inlined_call_operand.vmem [shape: f32[2,1,64], index: 9, kind: input, shape index: {}]   ;;  %s6599_s10 = inlined_call_operand.vmem [shape: f32[2,64,32], index: 10, kind: input, shape index: {}]   ;;  %s6600_s11 = inlined_call_operand.vmem [shape: f32[2,1,32], index: 11, kind: input, shape index: {}]   ;;  %s6601_s12 = inlined_call_operand.hbm [shape: f32[2,8,32], index: 12, kind: output, shape index: {}]  }
   0x1   :  { %6602 = sst [smem:[#allocation5_spill]] %s6589_s0 }
   0x2   :  { %6603 = sst [smem:[#allocation6_spill]] %s6590_s1 }
   0x3   :  { %6604 = sst [smem:[#allocation7_spill]] %s6591_s2 }
   0x4   :  { %17 = vsyncpa [#allocation3], 0 }
   0x5   :  { %19 = vsyncpa [#allocation3 + $0x1], 0  ;;  %s5675_s21 = smov 0   ;;  %s5677_s22 = smov 0  }
   0x6   :  { %s5679_s23 = smov 0   ;;  %s5681_s24 = smov 0  }
   0x7 LB: > { %s5696_s25 = sadd.s32 4294967295, %s5605_s24   ;;  %s4665_s26 = sadd.s32 4294967294, %s5605_s24   ;;  %s5605_s24 = sphi %s5681_s24, %s6613_s24   ;;  %s5601_s23 = sphi %s5679_s23, %s6612_s23   ;;  %s5597_s22 = sphi %s5677_s22, %s6611_s22   ;;  %s5593_s21 = sphi %s5675_s21, %s6610_s21  }
   0x8   : > { %s5700_s27 = sadd.s32 1, %s5605_s24   ;;  %s289_s28 = sadd.s32 1, %s5601_s23 }
   0x9   : > { %s286_s29 = ssub.s32 %s5605_s24, %s5700_s27  ;;  %p299_p0 = scmp.ne.s32.totalorder %s5601_s23, %s5597_s22 }
   0xa   : > { %p287_p1 = scmp.eq.s32.totalorder %s286_s29, 0  ;;  %p300_p2 = scmp.eq.s32.totalorder %s5696_s25, 1 }
   0xb   : > { %p305_p3 = scmp.ne.s32.totalorder %s5597_s22, %s5593_s21  ;;  %p306_p4 = scmp.eq.s32.totalorder %s4665_s26, 1 }
   0xc   : > { %s5711_s30 = scalar_select %p287_p1, %s5601_s23, %s289_s28  }
   0xd   : > { %p5713_p5 = por %p300_p2, %p299_p0  ;;  %p5717_p6 = por %p306_p4, %p305_p3 }
   0xe   : > { %p4668_p7 = scmp.ge.s32.totalorder %s5605_s24, 1  ;;  %p364_p8 = scmp.lt.s32.totalorder %s5605_s24, 3 }
  0x10   : > { %p365_p9 = pnand %p4668_p7, %p364_p8 }
  0x11   : > { %p405_p10 = scmp.lt.s32.totalorder (!%p365_p9), %s5696_s25, 1  ;;  %s6607_s0 = sld [smem:[#allocation5_spill]] (!%p365_p9) }
  0x12   : > { %368 = sbr.rel (%p365_p9) target bundleno = 4360 (0x1108), region = 68  ;;  %s6608_s1 = sld [smem:[#allocation6_spill]] (!%p365_p9) }
  0x13   : > { %s6609_s2 = sld [smem:[#allocation7_spill]] (!%p365_p9)  ;;  %s402_s29 = sand.u32 (!%p365_p9), 1, %s5597_s22  }
  0x14   : > { %s4817_s18 = sshll.u32 (!%p365_p9), %s5696_s25, 7 }
  0x17   : > { %s406_s15 = scalar_select %p405_p10, %s5696_s25, 1  ;;  %vm412_vm0 = vcmask 261120   ;;  %v5607_v7 = vmov 0.0   ;;  %v444_v8 = vld [vmem:[%s6592_s3 + $0x18] sm:$0xff]  ;;  %v443_v10 = vld [vmem:[%s6592_s3 + $0x10] sm:$0xff]  ;;  %v442_v12 = vld [vmem:[%s6592_s3 + $0x8] sm:$0xff] }
  0x18   : > { %5016 = vmatprep.subr.mxu0 %v5607_v7  ;;  %5027 = vmatprep.subr.mxu1 %v5607_v7  ;;  %v448_v9 = vld [vmem:[%s6592_s3 + $0x38] sm:$0xff]  ;;  %v447_v11 = vld [vmem:[%s6592_s3 + $0x30] sm:$0xff]  ;;  %v446_v13 = vld [vmem:[%s6592_s3 + $0x28] sm:$0xff]  ;;  %vm5608_vm1 = vmmov 0   ;;  %vm1332_vm2 = vcmask 64512   ;;  %vm2422_vm3 = vcmask 523264  }
  0x19   : > { %s4670_s16 = sshll.u32 %s406_s15, 3  ;;  %5017 = vmatpush3.msra.mxu0 %v444_v8  ;;  %5028 = vmatpush3.msra.mxu1 %v448_v9  ;;  %v441_v14 = vld [vmem:[%s6592_s3] sm:$0xff]  ;;  %v452_v25 = vld [vmem:[%s6592_s3 + $0x58] sm:$0xff]  ;;  %v451_v27 = vld [vmem:[%s6592_s3 + $0x50] sm:$0xff]  ;;  %s4669_s15 = sshll.u32 %s402_s29, 3 }
  0x1a   : > { %s408_s19 = scalar_lea.vmem %s6607_s0, %s4670_s16  ;;  %5018 = vmatprep.subr.mxu0 %v5607_v7  ;;  %5029 = vmatprep.subr.mxu1 %v5607_v7  ;;  %v445_v15 = vld [vmem:[%s6592_s3 + $0x20] sm:$0xff]  ;;  %v456_v26 = vld [vmem:[%s6592_s3 + $0x78] sm:$0xff]  ;;  %v455_v28 = vld [vmem:[%s6592_s3 + $0x70] sm:$0xff]  ;;  %s4604_s0 = scalar_lea.hbm %s6601_s12, %s4817_s18 }
  0x1b   : > { %v5728_v0 = vld [vmem:[%s408_s19] sm:$0xff]  ;;  %5019 = vmatpush3.msra.mxu0 %v443_v10  ;;  %5030 = vmatpush3.msra.mxu1 %v447_v11  ;;  %v450_v29 = vld [vmem:[%s6592_s3 + $0x48] sm:$0xff]  ;;  %v460_v33 = vld [vmem:[%s6592_s3 + $0x98] sm:$0xff]  ;;  %s404_s19 = scalar_lea.vmem [#allocation2], %s4669_s15  ;;  %s5609_s25 = smov [#allocation2]  }
  0x1c   : > { %v413_v1 = vsel %vm412_vm0, %v5728_v0, 0.0  ;;  %5020 = vmatprep.subr.mxu0 %v5607_v7  ;;  %5031 = vmatprep.subr.mxu1 %v5607_v7  ;;  %v4671_v20 = vld [vmem:[%s6608_s1] ss:$0 sm:$0xff]  ;;  %v454_v30 = vld [vmem:[%s6592_s3 + $0x68] sm:$0xff]  ;;  %v464_v34 = vld [vmem:[%s6592_s3 + $0xb8] sm:$0xff]  ;;  %s4606_s20 = sshll.u32 %s404_s19, 4  ;;  %s4607_s20 = int_to_ptr.vmem [resolvable:$true] %s4606_s20 }
  0x1d   : > { %414 = vadd.xlane.f32.xlu0 %v413_v1  ;;  %5021 = vmatpush3.msra.mxu0 %v442_v12  ;;  %v4672_v22 = vld [vmem:[%s6609_s2] ss:$0 sm:$0xff]  ;;  %v459_v35 = vld [vmem:[%s6592_s3 + $0x90] sm:$0xff]  ;;  %v458_v37 = vld [vmem:[%s6592_s3 + $0x88] sm:$0xff]  ;;  %s5549_s15 = sshll.u32 %s5609_s25, 4  ;;  %s5550_s15 = int_to_ptr.vmem [resolvable:$false] %s5549_s15 }
  0x1e   : > { %5032 = vmatpush3.msra.mxu1 %v446_v13  ;;  %5022 = vmatprep.subr.mxu0 %v5607_v7  ;;  %v449_v31 = vld [vmem:[%s6592_s3 + $0x40] sm:$0xff]  ;;  %v463_v36 = vld [vmem:[%s6592_s3 + $0xb0] sm:$0xff]  ;;  %v462_v38 = vld [vmem:[%s6592_s3 + $0xa8] sm:$0xff]  ;;  %s5551_s16 = scalar_lea.vmem %s5550_s15, 256  ;;  %p5552_p0 = scmp.lt.s32.totalorder %s4607_s20, %s5550_s15 }
  0x1f   : > { %5033 = vmatprep.subr.mxu1 %v5607_v7  ;;  %5023 = vmatpush3.msra.mxu0 %v441_v14  ;;  %v453_v32 = vld [vmem:[%s6592_s3 + $0x60] sm:$0xff]  ;;  %v468_v41 = vld [vmem:[%s6592_s3 + $0xd8] sm:$0xff]  ;;  %v467_v43 = vld [vmem:[%s6592_s3 + $0xd0] sm:$0xff] }
  0x20   : > { %5034 = vmatpush3.msra.mxu1 %v445_v15  ;;  %5024 = vmatprep.mubr.msk.f32.mxu0 %vm5608_vm1, %v5607_v7  ;;  %v457_v39 = vld [vmem:[%s6592_s3 + $0x80] sm:$0xff]  ;;  %v472_v42 = vld [vmem:[%s6592_s3 + $0xf8] sm:$0xff]  ;;  %v471_v44 = vld [vmem:[%s6592_s3 + $0xf0] sm:$0xff] }
  0x21   : > { %5035 = vmatprep.mubr.msk.f32.mxu1 %vm5608_vm1, %v5607_v7  ;;  %5038 = vmatprep.subr.mxu0 %v5607_v7  ;;  %v461_v40 = vld [vmem:[%s6592_s3 + $0xa0] sm:$0xff]  ;;  %v466_v45 = vld [vmem:[%s6592_s3 + $0xc8] sm:$0xff]  ;;  %v476_v49 = vld [vmem:[%s6592_s3 + $0x118] sm:$0xff] }
  0x22   : > { %5049 = vmatprep.subr.mxu1 %v5607_v7  ;;  %v470_v46 = vld [vmem:[%s6592_s3 + $0xe8] sm:$0xff]  ;;  %v465_v47 = vld [vmem:[%s6592_s3 + $0xc0] sm:$0xff]  ;;  %v480_v50 = vld [vmem:[%s6592_s3 + $0x138] sm:$0xff] }
  0x23   : > { %v469_v48 = vld [vmem:[%s6592_s3 + $0xe0] sm:$0xff]  ;;  %v475_v51 = vld [vmem:[%s6592_s3 + $0x110] sm:$0xff]  ;;  %v474_v53 = vld [vmem:[%s6592_s3 + $0x108] sm:$0xff] }
  0x24   : > { %v479_v52 = vld [vmem:[%s6592_s3 + $0x130] sm:$0xff]  ;;  %v478_v54 = vld [vmem:[%s6592_s3 + $0x128] sm:$0xff]  ;;  %v473_v55 = vld [vmem:[%s6592_s3 + $0x100] sm:$0xff] }
  0x25   : > { %v477_v56 = vld [vmem:[%s6592_s3 + $0x120] sm:$0xff]  ;;  %v484_v57 = vld [vmem:[%s6592_s3 + $0x158] sm:$0xff]  ;;  %v483_v59 = vld [vmem:[%s6592_s3 + $0x150] sm:$0xff] }
  0x26   : > { %v488_v58 = vld [vmem:[%s6592_s3 + $0x178] sm:$0xff]  ;;  %v487_v60 = vld [vmem:[%s6592_s3 + $0x170] sm:$0xff]  ;;  %v482_v61 = vld [vmem:[%s6592_s3 + $0x148] sm:$0xff] }
  0x27   : > { %v486_v62 = vld [vmem:[%s6592_s3 + $0x168] sm:$0xff]  ;;  %v481_v63 = vld [vmem:[%s6592_s3 + $0x140] sm:$0xff] }
  0x28   : > { %v485_v1 = vld [vmem:[%s6592_s3 + $0x160] sm:$0xff] }
  0xa6   : > { %v415_v2 = vpop.xlane.xlu0 %414 }
  0xa7   : > { %v417_v3 = vmul.f32 0.03125, %v415_v2 }
  0xa9   : > { %v418_v4 = vsub.f32 %v5728_v0, %v417_v3 }
  0xab   : > { %v419_v5 = vmul.f32 %v418_v4, %v418_v4 }
  0xad   : > { %v420_v6 = vsel %vm412_vm0, %v419_v5, 0.0 }
  0xae   : > { %421 = vadd.xlane.f32.xlu0 %v420_v6 }
 0x137   : > { %v422_v16 = vpop.xlane.xlu0 %421 }
 0x138   : > { %v423_v17 = vmul.f32 0.03125, %v422_v16 }
 0x13a   : > { %v424_v18 = vadd.f32 1e-05, %v423_v17 }
 0x13c   : > { %5501 = vrsqrt.f32 %v424_v18 }
 0x149   : > { %v5502_v19 = vpop.eup %5501 }
 0x14a   : > { %v426_v21 = vmul.f32 %v5502_v19, %v418_v4 }
 0x14c   : > { %v433_v23 = vmul.f32 %v4671_v20, %v426_v21 }
 0x14e   : > { %v5778_v24 = vadd.f32 %v4672_v22, %v433_v23 }
 0x150   : > { %5025 = vmatmul.mubr.msk.f32.vlgmr.msra.gmra.mxu0 %vm412_vm0, %v5778_v24  ;;  %5036 = vmatmul.mubr.msk.f32.vlgmr.msra.gmra.mxu1 %vm412_vm0, %v5778_v24 }
 0x151   : > { %5039 = vmatpush3.msra.mxu0 %v452_v25  ;;  %5050 = vmatpush3.msra.mxu1 %v456_v26 }
 0x152   : > { %5040 = vmatprep.subr.mxu0 %v5607_v7  ;;  %5051 = vmatprep.subr.mxu1 %v5607_v7 }
 0x153   : > { %5041 = vmatpush3.msra.mxu0 %v451_v27  ;;  %5052 = vmatpush3.msra.mxu1 %v455_v28 }
 0x154   : > { %5042 = vmatprep.subr.mxu0 %v5607_v7  ;;  %5053 = vmatprep.subr.mxu1 %v5607_v7 }
 0x155   : > { %5043 = vmatpush3.msra.mxu0 %v450_v29  ;;  %5054 = vmatpush3.msra.mxu1 %v454_v30 }
 0x156   : > { %5044 = vmatprep.subr.mxu0 %v5607_v7  ;;  %5055 = vmatprep.subr.mxu1 %v5607_v7 }
 0x157   : > { %5045 = vmatpush3.msra.mxu0 %v449_v31  ;;  %5046 = vmatprep.mubr.msk.f32.mxu0 %vm5608_vm1, %v5607_v7 }
 0x158   : > { %5056 = vmatpush3.msra.mxu1 %v453_v32  ;;  %5057 = vmatprep.mubr.msk.f32.mxu1 %vm5608_vm1, %v5607_v7 }
 0x159   : > { %5047 = vmatmul.mubr.msk.f32.vlgmr.msra.gmra.mxu0 %vm412_vm0, %v5778_v24  ;;  %5058 = vmatmul.mubr.msk.f32.vlgmr.msra.gmra.mxu1 %vm412_vm0, %v5778_v24 }
 0x15a   : > { %5060 = vmatprep.subr.mxu0 %v5607_v7  ;;  %5071 = vmatprep.subr.mxu1 %v5607_v7 }
 0x15b   : > { %5061 = vmatpush3.msra.mxu0 %v460_v33  ;;  %5072 = vmatpush3.msra.mxu1 %v464_v34 }
 0x15c   : > { %5062 = vmatprep.subr.mxu0 %v5607_v7  ;;  %5073 = vmatprep.subr.mxu1 %v5607_v7 }
 0x15d   : > { %5063 = vmatpush3.msra.mxu0 %v459_v35  ;;  %5074 = vmatpush3.msra.mxu1 %v463_v36 }
 0x15e   : > { %5064 = vmatprep.subr.mxu0 %v5607_v7  ;;  %5075 = vmatprep.subr.mxu1 %v5607_v7 }
 0x15f   : > { %5065 = vmatpush3.msra.mxu0 %v458_v37  ;;  %5076 = vmatpush3.msra.mxu1 %v462_v38 }
 0x160   : > { %5066 = vmatprep.subr.mxu0 %v5607_v7  ;;  %5077 = vmatprep.subr.mxu1 %v5607_v7 }
 0x161   : > { %5067 = vmatpush3.msra.mxu0 %v457_v39  ;;  %5068 = vmatprep.mubr.msk.f32.mxu0 %vm5608_vm1, %v5607_v7 }
 0x162   : > { %5078 = vmatpush3.msra.mxu1 %v461_v40  ;;  %5079 = vmatprep.mubr.msk.f32.mxu1 %vm5608_vm1, %v5607_v7 }
 0x163   : > { %5069 = vmatmul.mubr.msk.f32.vlgmr.msra.gmra.mxu0 %vm412_vm0, %v5778_v24  ;;  %5080 = vmatmul.mubr.msk.f32.vlgmr.msra.gmra.mxu1 %vm412_vm0, %v5778_v24 }
 0x164   : > { %5082 = vmatprep.subr.mxu0 %v5607_v7  ;;  %5093 = vmatprep.subr.mxu1 %v5607_v7 }
 0x165   : > { %5083 = vmatpush3.msra.mxu0 %v468_v41  ;;  %5094 = vmatpush3.msra.mxu1 %v472_v42 }
 0x166   : > { %5084 = vmatprep.subr.mxu0 %v5607_v7  ;;  %5095 = vmatprep.subr.mxu1 %v5607_v7 }
 0x167   : > { %5085 = vmatpush3.msra.mxu0 %v467_v43  ;;  %5096 = vmatpush3.msra.mxu1 %v471_v44 }
 0x168   : > { %5086 = vmatprep.subr.mxu0 %v5607_v7  ;;  %5097 = vmatprep.subr.mxu1 %v5607_v7 }
 0x169   : > { %5087 = vmatpush3.msra.mxu0 %v466_v45  ;;  %5098 = vmatpush3.msra.mxu1 %v470_v46 }
 0x16a   : > { %5088 = vmatprep.subr.mxu0 %v5607_v7  ;;  %5099 = vmatprep.subr.mxu1 %v5607_v7 }
 0x16b   : > { %5089 = vmatpush3.msra.mxu0 %v465_v47  ;;  %5090 = vmatprep.mubr.msk.f32.mxu0 %vm5608_vm1, %v5607_v7 }
 0x16c   : > { %5100 = vmatpush3.msra.mxu1 %v469_v48  ;;  %5101 = vmatprep.mubr.msk.f32.mxu1 %vm5608_vm1, %v5607_v7 }
 0x16d   : > { %5091 = vmatmul.mubr.msk.f32.vlgmr.msra.gmra.mxu0 %vm412_vm0, %v5778_v24  ;;  %5102 = vmatmul.mubr.msk.f32.vlgmr.msra.gmra.mxu1 %vm412_vm0, %v5778_v24 }
 0x16e   : > { %5104 = vmatprep.subr.mxu0 %v5607_v7  ;;  %5115 = vmatprep.subr.mxu1 %v5607_v7 }
 0x16f   : > { %5105 = vmatpush3.msra.mxu0 %v476_v49  ;;  %5116 = vmatpush3.msra.mxu1 %v480_v50 }
 0x170   : > { %5106 = vmatprep.subr.mxu0 %v5607_v7  ;;  %5117 = vmatprep.subr.mxu1 %v5607_v7 }
 0x171   : > { %5107 = vmatpush3.msra.mxu0 %v475_v51  ;;  %5118 = vmatpush3.msra.mxu1 %v479_v52 }
 0x172   : > { %5108 = vmatprep.subr.mxu0 %v5607_v7  ;;  %5119 = vmatprep.subr.mxu1 %v5607_v7 }
 0x173   : > { %5109 = vmatpush3.msra.mxu0 %v474_v53  ;;  %5120 = vmatpush3.msra.mxu1 %v478_v54 }
 0x174   : > { %5110 = vmatprep.subr.mxu0 %v5607_v7  ;;  %5121 = vmatprep.subr.mxu1 %v5607_v7 }
 0x175   : > { %5111 = vmatpush3.msra.mxu0 %v473_v55  ;;  %5112 = vmatprep.mubr.msk.f32.mxu0 %vm5608_vm1, %v5607_v7 }
 0x176   : > { %5122 = vmatpush3.msra.mxu1 %v477_v56  ;;  %5123 = vmatprep.mubr.msk.f32.mxu1 %vm5608_vm1, %v5607_v7 }
 0x177   : > { %5113 = vmatmul.mubr.msk.f32.vlgmr.msra.gmra.mxu0 %vm412_vm0, %v5778_v24  ;;  %5124 = vmatmul.mubr.msk.f32.vlgmr.msra.gmra.mxu1 %vm412_vm0, %v5778_v24 }
 0x178   : > { %5126 = vmatprep.subr.mxu0 %v5607_v7  ;;  %5137 = vmatprep.subr.mxu1 %v5607_v7 }
 0x179   : > { %5127 = vmatpush3.msra.mxu0 %v484_v57  ;;  %5138 = vmatpush3.msra.mxu1 %v488_v58 }
 0x17a   : > { %5128 = vmatprep.subr.mxu0 %v5607_v7  ;;  %5139 = vmatprep.subr.mxu1 %v5607_v7 }
 0x17b   : > { %5129 = vmatpush3.msra.mxu0 %v483_v59  ;;  %5140 = vmatpush3.msra.mxu1 %v487_v60 }
 0x17c   : > { %5130 = vmatprep.subr.mxu0 %v5607_v7  ;;  %5141 = vmatprep.subr.mxu1 %v5607_v7 }
 0x17d   : > { %5131 = vmatpush3.msra.mxu0 %v482_v61  ;;  %5142 = vmatpush3.msra.mxu1 %v486_v62 }
 0x17e   : > { %5132 = vmatprep.subr.mxu0 %v5607_v7  ;;  %5143 = vmatprep.subr.mxu1 %v5607_v7 }
 0x17f   : > { %5133 = vmatpush3.msra.mxu0 %v481_v63  ;;  %5134 = vmatprep.mubr.msk.f32.mxu0 %vm5608_vm1, %v5607_v7 }
 0x180   : > { %5144 = vmatpush3.msra.mxu1 %v485_v1  ;;  %5145 = vmatprep.mubr.msk.f32.mxu1 %vm5608_vm1, %v5607_v7 }
 0x181   : > { %5135 = vmatmul.mubr.msk.f32.vlgmr.msra.gmra.mxu0 %vm412_vm0, %v5778_v24  ;;  %5146 = vmatmul.mubr.msk.f32.vlgmr.msra.gmra.mxu1 %vm412_vm0, %v5778_v24 }
 0x182   : > { %5148 = vmatprep.subr.mxu0 %v5607_v7  ;;  %5150 = vmatprep.mubr.msk.f32.mxu0 %vm5608_vm1, %v5607_v7 }
 0x183   : > { %5163 = vmatprep.subr.mxu1 %v5607_v7  ;;  %5165 = vmatprep.mubr.msk.f32.mxu1 %vm5608_vm1, %v5607_v7 }
 0x210   : > { %v558_v2 = vpop.f32.mrf.mxu0  ;;  %v628_v3 = vpop.f32.mrf.mxu1 }
 0x212   : > { %v5026_v4 = vpop.f32.mrf.mxu0  ;;  %v5037_v5 = vpop.f32.mrf.mxu1 }
 0x219   : > { %v698_v6 = vpop.f32.mrf.mxu0  ;;  %v768_v8 = vpop.f32.mrf.mxu1 }
 0x21b   : > { %v5048_v9 = vpop.f32.mrf.mxu0  ;;  %v5059_v10 = vpop.f32.mrf.mxu1 }
 0x223   : > { %v838_v11 = vpop.f32.mrf.mxu0  ;;  %v908_v12 = vpop.f32.mrf.mxu1 }
 0x224   : > { %5149 = vmatpush3.xpose.msk.msra.mxu0 %vm1332_vm2, %v838_v11 }
 0x225   : > { %v5070_v13 = vpop.f32.mrf.mxu0  ;;  %v5081_v14 = vpop.f32.mrf.mxu1  ;;  %5153 = vmatprep.subr.mxu0 %v5607_v7 }
 0x226   : > { %v1977_v13 = vld [vmem:[%s6593_s4] sm:$0xff]  ;;  %v1978_v14 = vld [vmem:[%s6593_s4 + $0x8] sm:$0xff] }
 0x227   : > { %5151 = vmatmul.mubr.msk.f32.vlgmr.msra.gmra.mxu0 %vm1332_vm2, %v558_v2 }
 0x228   : > { %5154 = vmatpush3.xpose.msk.msra.mxu0 %vm1332_vm2, %v908_v12  ;;  %5155 = vmatprep.mubr.msk.f32.mxu0 %vm5608_vm1, %v5607_v7 }
 0x229   : > { %5158 = vmatprep.subr.mxu0 %v5607_v7 }
 0x22b   : > { %5156 = vmatmul.mubr.msk.f32.vlgmr.msra.gmra.mxu0 %vm1332_vm2, %v628_v3 }
 0x22c   : > { %5160 = vmatprep.mubr.msk.f32.mxu0 %vm5608_vm1, %v5607_v7 }
 0x22d   : > { %v978_v15 = vpop.f32.mrf.mxu0  ;;  %v1048_v16 = vpop.f32.mrf.mxu1 }
 0x22e   : > { %5159 = vmatpush3.xpose.msk.msra.mxu0 %vm1332_vm2, %v978_v15  ;;  %5164 = vmatpush3.xpose.msk.msra.mxu1 %vm1332_vm2, %v1048_v16  ;;  %v1979_v15 = vld [vmem:[%s6593_s4 + $0x10] sm:$0xff] }
 0x22f   : > { %v5092_v17 = vpop.f32.mrf.mxu0  ;;  %v5103_v18 = vpop.f32.mrf.mxu1  ;;  %5168 = vmatprep.subr.mxu0 %v5607_v7  ;;  %5173 = vmatprep.subr.mxu1 %v5607_v7 }
 0x230   : > { %v1980_v18 = vld [vmem:[%s6593_s4 + $0x18] sm:$0xff] }
 0x231   : > { %5161 = vmatmul.mubr.msk.f32.vlgmr.msra.gmra.mxu0 %vm1332_vm2, %v698_v6  ;;  %5166 = vmatmul.mubr.msk.f32.vlgmr.msra.gmra.mxu1 %vm1332_vm2, %v768_v8 }
 0x232   : > { %5170 = vmatprep.mubr.msk.f32.mxu0 %vm5608_vm1, %v5607_v7  ;;  %5175 = vmatprep.mubr.msk.f32.mxu1 %vm5608_vm1, %v5607_v7 }
 0x237   : > { %v1118_v19 = vpop.f32.mrf.mxu0  ;;  %v1188_v20 = vpop.f32.mrf.mxu1 }
 0x238   : > { %5169 = vmatpush3.msra.mxu0 %v1118_v19  ;;  %5174 = vmatpush3.msra.mxu1 %v1188_v20 }
 0x239   : > { %v5114_v21 = vpop.f32.mrf.mxu0  ;;  %v5125_v22 = vpop.f32.mrf.mxu1  ;;  %5178 = vmatprep.subr.mxu0 %v5607_v7  ;;  %5183 = vmatprep.subr.mxu1 %v5607_v7 }
 0x241   : > { %v6010_v23 = vpop.f32.mrf.mxu0  ;;  %v6012_v24 = vpop.f32.mrf.mxu1 }
 0x243   : > { %v5136_v25 = vpop.f32.mrf.mxu0  ;;  %v5147_v26 = vpop.f32.mrf.mxu1 }
 0x2e7   : > { %v1405_v27 = vpop.f32.mrf.mxu0 }
 0x2e8   : > { %v1637_v28 = vmul.f32 0.35355338, %v1405_v27 }
 0x2e9   : > { %v5152_v29 = vpop.f32.mrf.mxu0 }
 0x2ea   : > { %v1641_v30 = vsel %vm1332_vm2, %v1637_v28, -inf }
 0x2eb   : > { %1642 = vmax.xlane.f32.xlu1 %v1641_v30  ;;  %v1481_v31 = vpop.f32.mrf.mxu0 }
 0x2ec   : > { %v1638_v32 = vmul.f32 0.35355338, %v1481_v31 }
 0x2ed   : > { %v5157_v33 = vpop.f32.mrf.mxu0 }
 0x2ee   : > { %v1644_v34 = vsel %vm1332_vm2, %v1638_v32, -inf }
 0x2ef   : > { %1645 = vmax.xlane.f32.xlu1 %v1644_v34 }
 0x2f1   : > { %v1633_v35 = vpop.f32.mrf.mxu1  ;;  %v1557_v36 = vpop.f32.mrf.mxu0 }
 0x2f2   : > { %v1640_v37 = vmul.f32 0.35355338, %v1633_v35  ;;  %v1639_v38 = vmul.f32 0.35355338, %v1557_v36 }
 0x2f3   : > { %v5162_v39 = vpop.f32.mrf.mxu0  ;;  %v5167_v40 = vpop.f32.mrf.mxu1 }
 0x2f4   : > { %v1650_v41 = vsel %vm1332_vm2, %v1640_v37, -inf  ;;  %v1647_v42 = vsel %vm1332_vm2, %v1639_v38, -inf  ;;  %v4701_v39 = vld [vmem:[%s6594_s5] ss:$0 sm:$0xff] }
 0x2f5   : > { %1651 = vmax.xlane.f32.xlu1 %v1650_v41  ;;  %1648 = vmax.xlane.f32.xlu0 %v1647_v42 }
 0x374   : > { %v1643_v43 = vpop.xlane.xlu1 %1642 }
 0x375   : > { %v1653_v44 = vsub.f32 %v1637_v28, %v1643_v43 }
 0x377   : > { %v1657_v45 = vmul.f32 1.442695, %v1653_v44 }
 0x378   : > { %v1646_v46 = vpop.xlane.xlu1 %1645 }
 0x379   : > { %5503 = vpow2.f32 %v1657_v45  ;;  %v1654_v47 = vsub.f32 %v1638_v32, %v1646_v46 }
 0x37b   : > { %v1659_v48 = vmul.f32 1.442695, %v1654_v47 }
 0x37d   : > { %5505 = vpow2.f32 %v1659_v48 }
 0x37e   : > { %v1652_v49 = vpop.xlane.xlu1 %1651  ;;  %v1649_v50 = vpop.xlane.xlu0 %1648 }
 0x37f   : > { %v1656_v51 = vsub.f32 %v1640_v37, %v1652_v49  ;;  %v1655_v52 = vsub.f32 %v1639_v38, %v1649_v50  ;;  %v2321_v49 = vld [vmem:[%s6597_s8 + $0x18] sm:$0xff]  ;;  %v2319_v50 = vld [vmem:[%s6597_s8 + $0x8] sm:$0xff] }
 0x381   : > { %v1663_v53 = vmul.f32 1.442695, %v1656_v51  ;;  %v1661_v54 = vmul.f32 1.442695, %v1655_v52  ;;  %v2318_v51 = vld [vmem:[%s6597_s8] sm:$0xff] }
 0x383   : > { %5507 = vpow2.f32 %v1663_v53 }
 0x384   : > { %5509 = vpow2.f32 %v1661_v54 }
 0x386   : > { %v5504_v55 = vpop.eup %5503 }
 0x387   : > { %v1665_v56 = vsel %vm1332_vm2, %v5504_v55, 0.0 }
 0x388   : > { %1666 = vadd.xlane.f32.xlu0 %v1665_v56  ;;  %v4702_v56 = vld [vmem:[%s6595_s6] ss:$0 sm:$0xff] }
 0x38a   : > { %v5506_v57 = vpop.eup %5505 }
 0x38b   : > { %v1668_v58 = vsel %vm1332_vm2, %v5506_v57, 0.0 }
 0x38c   : > { %1669 = vadd.xlane.f32.xlu1 %v1668_v58  ;;  %v4703_v58 = vld [vmem:[%s6596_s7] ss:$0 sm:$0xff] }
 0x390   : > { %v5508_v59 = vpop.eup %5507 }
 0x391   : > { %v5510_v60 = vpop.eup %5509  ;;  %v1674_v61 = vsel %vm1332_vm2, %v5508_v59, 0.0 }
 0x392   : > { %1675 = vadd.xlane.f32.xlu1 %v1674_v61  ;;  %v1671_v62 = vsel %vm1332_vm2, %v5510_v60, 0.0  ;;  %v2414_v61 = vld [vmem:[%s6599_s10 + $0x38] sm:$0xff] }
 0x393   : > { %1672 = vadd.xlane.f32.xlu0 %v1671_v62  ;;  %v2413_v62 = vld [vmem:[%s6599_s10 + $0x30] sm:$0xff] }
 0x411   : > { %v1667_v63 = vpop.xlane.xlu0 %1666 }
 0x412   : > { %5511 = vrcp.f32 %v1667_v63  ;;  %v2412_v63 = vld [vmem:[%s6599_s10 + $0x28] sm:$0xff] }
 0x415   : > { %v1670_v1 = vpop.xlane.xlu1 %1669 }
 0x416   : > { %5513 = vrcp.f32 %v1670_v1  ;;  %v2411_v1 = vld [vmem:[%s6599_s10 + $0x20] sm:$0xff] }
 0x41b   : > { %v1676_v2 = vpop.xlane.xlu1 %1675 }
 0x41c   : > { %5515 = vrcp.f32 %v1676_v2  ;;  %v1673_v3 = vpop.xlane.xlu0 %1672  ;;  %v2410_v2 = vld [vmem:[%s6599_s10 + $0x18] sm:$0xff] }
 0x41d   : > { %5517 = vrcp.f32 %v1673_v3  ;;  %v2409_v3 = vld [vmem:[%s6599_s10 + $0x10] sm:$0xff] }
 0x41f   : > { %v5512_v4 = vpop.eup %5511 }
 0x420   : > { %v1681_v5 = vmul.f32 %v5512_v4, %v5504_v55  ;;  %v2408_v4 = vld [vmem:[%s6599_s10 + $0x8] sm:$0xff] }
 0x422   : > { %5171 = vmatmul.mubr.msk.f32.vlgmr.msra.gmra.mxu0 %vm1332_vm2, %v1681_v5  ;;  %v2407_v5 = vld [vmem:[%s6599_s10] sm:$0xff] }
 0x423   : > { %v5514_v6 = vpop.eup %5513  ;;  %5179 = vmatpush3.msra.mxu0 %v6010_v23  ;;  %5180 = vmatprep.mubr.msk.f32.mxu0 %vm5608_vm1, %v5607_v7 }
 0x424   : > { %v1682_v8 = vmul.f32 %v5514_v6, %v5506_v57  ;;  %5188 = vmatprep.subr.mxu0 %v5607_v7  ;;  %v4704_v6 = vld [vmem:[%s6598_s9] ss:$0 sm:$0xff] }
 0x426   : > { %5176 = vmatmul.mubr.msk.f32.vlgmr.msra.gmra.mxu1 %vm1332_vm2, %v1682_v8 }
 0x427   : > { %5184 = vmatpush3.msra.mxu1 %v6012_v24  ;;  %5185 = vmatprep.mubr.msk.f32.mxu1 %vm5608_vm1, %v5607_v7 }
 0x428   : > { %5193 = vmatprep.subr.mxu1 %v5607_v7 }
 0x429   : > { %v5516_v9 = vpop.eup %5515 }
 0x42a   : > { %v5518_v10 = vpop.eup %5517  ;;  %v1684_v11 = vmul.f32 %v5516_v9, %v5508_v59 }
 0x42b   : > { %v1683_v12 = vmul.f32 %v5518_v10, %v5510_v60 }
 0x42c   : > { %5186 = vmatmul.mubr.msk.f32.vlgmr.msra.gmra.mxu1 %vm1332_vm2, %v1684_v11 }
 0x42d   : > { %5181 = vmatmul.mubr.msk.f32.vlgmr.msra.gmra.mxu0 %vm1332_vm2, %v1683_v12  ;;  %5195 = vmatprep.mubr.msk.f32.mxu1 %vm5608_vm1, %v5607_v7 }
 0x42e   : > { %5190 = vmatprep.mubr.msk.f32.mxu0 %vm5608_vm1, %v5607_v7  ;;  %5189 = vmatpush3.msra.mxu0 %v1977_v13 }
 0x42f   : > { %5198 = vmatprep.subr.mxu0 %v5607_v7  ;;  %5194 = vmatpush3.msra.mxu1 %v1978_v14 }
 0x430   : > { %5203 = vmatprep.subr.mxu1 %v5607_v7 }
 0x4e2   : > { %v1754_v16 = vpop.f32.mrf.mxu0 }
 0x4e3   : > { %5191 = vmatmul.mubr.msk.f32.vlgmr.msra.gmra.mxu0 %vm1332_vm2, %v1754_v16  ;;  %v4706_v16 = vld [vmem:[%s6600_s11] ss:$0 sm:$0xff] }
 0x4e4   : > { %v5172_v17 = vpop.f32.mrf.mxu0  ;;  %5199 = vmatpush3.msra.mxu0 %v1979_v15  ;;  %5200 = vmatprep.mubr.msk.f32.mxu0 %vm5608_vm1, %v5607_v7 }
 0x4e5   : > { %5208 = vmatprep.subr.mxu0 %v5607_v7 }
 0x4e6   : > { %v1827_v19 = vpop.f32.mrf.mxu1 }
 0x4e7   : > { %5196 = vmatmul.mubr.msk.f32.vlgmr.msra.gmra.mxu1 %vm1332_vm2, %v1827_v19 }
 0x4e8   : > { %v5177_v20 = vpop.f32.mrf.mxu1  ;;  %5204 = vmatpush3.msra.mxu1 %v1980_v18  ;;  %5205 = vmatprep.mubr.msk.f32.mxu1 %vm5608_vm1, %v5607_v7 }
 0x4e9   : > { %5219 = vmatprep.subr.mxu1 %v5607_v7 }
 0x4ec   : > { %v1973_v21 = vpop.f32.mrf.mxu1 }
 0x4ed   : > { %v1900_v22 = vpop.f32.mrf.mxu0  ;;  %5206 = vmatmul.mubr.msk.f32.vlgmr.msra.gmra.mxu1 %vm1332_vm2, %v1973_v21 }
 0x4ee   : > { %5201 = vmatmul.mubr.msk.f32.vlgmr.msra.gmra.mxu0 %vm1332_vm2, %v1900_v22  ;;  %v5187_v23 = vpop.f32.mrf.mxu1  ;;  %5235 = vmatprep.mubr.msk.f32.mxu1 %vm5608_vm1, %v5607_v7 }
 0x4ef   : > { %v5182_v24 = vpop.f32.mrf.mxu0  ;;  %5216 = vmatprep.mubr.msk.f32.mxu0 %vm5608_vm1, %v5607_v7  ;;  %5209 = vmatpush3.msra.mxu0 %v2321_v49  ;;  %v4729_v49 = vld [vmem:[%s6592_s3 + $0x208] sm:$0xff] }
 0x4f0   : > { %5210 = vmatprep.subr.mxu0 %v5607_v7  ;;  %5220 = vmatpush3.msra.mxu1 %v2414_v61  ;;  %v4734_v61 = vld [vmem:[%s6592_s3 + $0x230] sm:$0xff] }
 0x4f1   : > { %5221 = vmatprep.subr.mxu1 %v5607_v7 }
 0x4f2   : > { %5222 = vmatpush3.msra.mxu1 %v2413_v62  ;;  %v4746_v62 = vld [vmem:[%s6592_s3 + $0x290] sm:$0xff] }
 0x4f3   : > { %5223 = vmatprep.subr.mxu1 %v5607_v7 }
 0x4f4   : > { %5224 = vmatpush3.msra.mxu1 %v2412_v63  ;;  %v4733_v63 = vld [vmem:[%s6592_s3 + $0x228] sm:$0xff] }
 0x4f5   : > { %5225 = vmatprep.subr.mxu1 %v5607_v7 }
 0x4f6   : > { %5226 = vmatpush3.msra.mxu1 %v2411_v1  ;;  %v4745_v1 = vld [vmem:[%s6592_s3 + $0x288] sm:$0xff] }
 0x4f7   : > { %5227 = vmatprep.subr.mxu1 %v5607_v7 }
 0x4f8   : > { %5228 = vmatpush3.msra.mxu1 %v2410_v2  ;;  %v4732_v2 = vld [vmem:[%s6592_s3 + $0x220] sm:$0xff] }
 0x4f9   : > { %5229 = vmatprep.subr.mxu1 %v5607_v7 }
 0x4fa   : > { %5230 = vmatpush3.msra.mxu1 %v2409_v3  ;;  %v4744_v3 = vld [vmem:[%s6592_s3 + $0x280] sm:$0xff] }
 0x4fb   : > { %5231 = vmatprep.subr.mxu1 %v5607_v7 }
 0x4fc   : > { %5232 = vmatpush3.msra.mxu1 %v2408_v4  ;;  %v4743_v4 = vld [vmem:[%s6592_s3 + $0x278] sm:$0xff] }
 0x4fd   : > { %5233 = vmatprep.subr.mxu1 %v5607_v7 }
 0x4fe   : > { %5234 = vmatpush3.msra.mxu1 %v2407_v5  ;;  %v4755_v5 = vld [vmem:[%s6592_s3 + $0x2d8] sm:$0xff] }
 0x4ff   : > { %5260 = vmatprep.subr.mxu1 %v5607_v7 }
 0x5a3   : > { %v2050_v25 = vpop.f32.mrf.mxu0 }
 0x5a4   : > { %v2273_v30 = vsel %vm412_vm0, %v2050_v25, 0.0 }
 0x5a5   : > { %v5192_v26 = vpop.f32.mrf.mxu0 }
 0x5a7   : > { %v2123_v27 = vpop.f32.mrf.mxu1 }
 0x5a8   : > { %v2274_v29 = vsel %vm412_vm0, %v2123_v27, 0.0  ;;  %v4715_v27 = vld [vmem:[%s6592_s3 + $0x198] sm:$0xff] }
 0x5a9   : > { %v5197_v28 = vpop.f32.mrf.mxu1  ;;  %v2275_v32 = vadd.f32 %v2274_v29, %v2273_v30  ;;  %v4714_v29 = vld [vmem:[%s6592_s3 + $0x190] sm:$0xff] }
 0x5aa   : > { %v4723_v28 = vld [vmem:[%s6592_s3 + $0x1d8] sm:$0xff]  ;;  %v4722_v30 = vld [vmem:[%s6592_s3 + $0x1d0] sm:$0xff] }
 0x5ad   : > { %v2269_v31 = vpop.f32.mrf.mxu1 }
 0x5ae   : > { %v2196_v33 = vpop.f32.mrf.mxu0  ;;  %v2278_v38 = vsel %vm412_vm0, %v2269_v31, 0.0  ;;  %v4713_v31 = vld [vmem:[%s6592_s3 + $0x188] sm:$0xff] }
 0x5af   : > { %v2276_v34 = vsel %vm412_vm0, %v2196_v33, 0.0  ;;  %v5207_v35 = vpop.f32.mrf.mxu1  ;;  %v4712_v33 = vld [vmem:[%s6592_s3 + $0x180] sm:$0xff] }
 0x5b0   : > { %v2277_v36 = vadd.f32 %v2276_v34, %v2275_v32  ;;  %v5202_v37 = vpop.f32.mrf.mxu0  ;;  %v4721_v32 = vld [vmem:[%s6592_s3 + $0x1c8] sm:$0xff]  ;;  %v4720_v34 = vld [vmem:[%s6592_s3 + $0x1c0] sm:$0xff] }
 0x5b2   : > { %v2279_v40 = vadd.f32 %v2278_v38, %v2277_v36 }
 0x5b4   : > { %v2287_v41 = vadd.f32 %v4701_v39, %v2279_v40  ;;  %v4710_v39 = vld [vmem:[%s6608_s1 + $0x1] ss:$0 sm:$0xff]  ;;  %s4593_s1 = scalar_lea.sflag [#allocation3], %s402_s29 }
 0x5b6   : > { %v6074_v42 = vadd.f32 %v2287_v41, %v5728_v0  ;;  %v2320_v0 = vld [vmem:[%s6597_s8 + $0x10] sm:$0xff]  ;;  %v4711_v41 = vld [vmem:[%s6609_s2 + $0x1] ss:$0 sm:$0xff]  ;;  %s5545_s2 = scalar_lea.vmem %s4607_s20, 128 }
 0x5b7   : > { %5211 = vmatpush3.msra.mxu0 %v2320_v0  ;;  %v4716_v0 = vld [vmem:[%s6592_s3 + $0x1a0] sm:$0xff]  ;;  %p5546_p11 = scmp.ne.s32.totalorder %s4607_s20, %s5545_s2  ;;  %p5553_p1 = scmp.lt.s32.totalorder %s5551_s16, %s5545_s2 }
 0x5b8   : > { %v2291_v43 = vsel %vm412_vm0, %v6074_v42, 0.0  ;;  %5212 = vmatprep.subr.mxu0 %v5607_v7 }
 0x5b9   : > { %2292 = vadd.xlane.f32.xlu0 %v2291_v43  ;;  %5213 = vmatpush3.msra.mxu0 %v2319_v50  ;;  %v4728_v50 = vld [vmem:[%s6592_s3 + $0x200] sm:$0xff]  ;;  %p5547_p12 = pnand %p5546_p11, %p5713_p5  ;;  %p5554_p2 = por %p5553_p1, %p5552_p0 }
 0x5ba   : > { %5214 = vmatprep.subr.mxu0 %v5607_v7 }
 0x5bb   : > { %5215 = vmatpush3.msra.mxu0 %v2318_v51  ;;  %v4727_v51 = vld [vmem:[%s6592_s3 + $0x1f8] sm:$0xff]  ;;  %p5548_p13 = pneg %p5547_p12 }
 0x5bc   : > { %5238 = vmatprep.subr.mxu0 %v5607_v7 }
 0x5bd   : > { %p5555_p3 = pnand %p5554_p2, %p5548_p13 }
 0x642   : > { %v2293_v44 = vpop.xlane.xlu0 %2292 }
 0x643   : > { %v2294_v45 = vmul.f32 0.03125, %v2293_v44  ;;  %v4719_v44 = vld [vmem:[%s6592_s3 + $0x1b8] sm:$0xff] }
 0x645   : > { %v2295_v46 = vsub.f32 %v6074_v42, %v2294_v45  ;;  %v4731_v45 = vld [vmem:[%s6592_s3 + $0x218] sm:$0xff] }
 0x647   : > { %v2296_v47 = vmul.f32 %v2295_v46, %v2295_v46 }
 0x649   : > { %v2297_v48 = vsel %vm412_vm0, %v2296_v47, 0.0  ;;  %v4730_v47 = vld [vmem:[%s6592_s3 + $0x210] sm:$0xff] }
 0x64a   : > { %2298 = vadd.xlane.f32.xlu1 %v2297_v48  ;;  %v4717_v48 = vld [vmem:[%s6592_s3 + $0x1a8] sm:$0xff] }
 0x6d3   : > { %v2299_v52 = vpop.xlane.xlu1 %2298 }
 0x6d4   : > { %v2300_v53 = vmul.f32 0.03125, %v2299_v52  ;;  %v4739_v52 = vld [vmem:[%s6592_s3 + $0x258] sm:$0xff] }
 0x6d6   : > { %v2301_v54 = vadd.f32 1e-05, %v2300_v53  ;;  %v4726_v53 = vld [vmem:[%s6592_s3 + $0x1f0] sm:$0xff] }
 0x6d8   : > { %5519 = vrsqrt.f32 %v2301_v54  ;;  %v4738_v54 = vld [vmem:[%s6592_s3 + $0x250] sm:$0xff] }
 0x6e5   : > { %v5520_v55 = vpop.eup %5519 }
 0x6e6   : > { %v2303_v57 = vmul.f32 %v5520_v55, %v2295_v46  ;;  %v4718_v46 = vld [vmem:[%s6592_s3 + $0x1b0] sm:$0xff]  ;;  %v4725_v55 = vld [vmem:[%s6592_s3 + $0x1e8] sm:$0xff] }
 0x6e8   : > { %v2310_v59 = vmul.f32 %v4702_v56, %v2303_v57  ;;  %v4737_v56 = vld [vmem:[%s6592_s3 + $0x248] sm:$0xff]  ;;  %v4724_v57 = vld [vmem:[%s6592_s3 + $0x1e0] sm:$0xff] }
 0x6ea   : > { %v2317_v60 = vadd.f32 %v4703_v58, %v2310_v59  ;;  %v4736_v58 = vld [vmem:[%s6592_s3 + $0x240] sm:$0xff]  ;;  %v4735_v59 = vld [vmem:[%s6592_s3 + $0x238] sm:$0xff] }
 0x6ec   : > { %5217 = vmatmul.mubr.msk.f32.vlgmr.msra.gmra.mxu0 %vm412_vm0, %v2317_v60  ;;  %v4747_v60 = vld [vmem:[%s6592_s3 + $0x298] sm:$0xff] }
 0x6ed   : > { %5246 = vmatprep.mubr.msk.f32.mxu0 %vm5608_vm1, %v5607_v7  ;;  %5239 = vmatpush3.msra.mxu0 %v4715_v27 }
 0x6ee   : > { %5240 = vmatprep.subr.mxu0 %v5607_v7 }
 0x6ef   : > { %5241 = vmatpush3.msra.mxu0 %v4714_v29 }
 0x6f0   : > { %5242 = vmatprep.subr.mxu0 %v5607_v7 }
 0x6f1   : > { %5243 = vmatpush3.msra.mxu0 %v4713_v31 }
 0x6f2   : > { %5244 = vmatprep.subr.mxu0 %v5607_v7 }
 0x6f3   : > { %5245 = vmatpush3.msra.mxu0 %v4712_v33 }
 0x6f4   : > { %5249 = vmatprep.subr.mxu0 %v5607_v7 }
 0x7ac   : > { %v2398_v8 = vpop.f32.mrf.mxu0 }
 0x7ad   : > { %v2399_v9 = vadd.f32 %v4704_v6, %v2398_v8  ;;  %v4742_v6 = vld [vmem:[%s6592_s3 + $0x270] sm:$0xff] }
 0x7ae   : > { %v5218_v10 = vpop.f32.mrf.mxu0  ;;  %v4754_v8 = vld [vmem:[%s6592_s3 + $0x2d0] sm:$0xff] }
 0x7af   : > { %v2403_v11 = vmul.f32 0.70710677, %v2399_v9  ;;  %v2402_v13 = vmul.f32 0.5, %v2399_v9  ;;  %v4741_v9 = vld [vmem:[%s6592_s3 + $0x268] sm:$0xff] }
 0x7b0   : > { %v4753_v10 = vld [vmem:[%s6592_s3 + $0x2c8] sm:$0xff] }
 0x7b1   : > { %5521 = verf.f32 %v2403_v11  ;;  %v4740_v11 = vld [vmem:[%s6592_s3 + $0x260] sm:$0xff] }
 0x7be   : > { %v5522_v12 = vpop.eup %5521 }
 0x7bf   : > { %v2405_v14 = vadd.f32 1.0, %v5522_v12  ;;  %v4752_v12 = vld [vmem:[%s6592_s3 + $0x2c0] sm:$0xff] }
 0x7c1   : > { %v2406_v15 = vmul.f32 %v2405_v14, %v2402_v13  ;;  %v4751_v13 = vld [vmem:[%s6592_s3 + $0x2b8] sm:$0xff]  ;;  %v4750_v14 = vld [vmem:[%s6592_s3 + $0x2b0] sm:$0xff] }
 0x7c3   : > { %5236 = vmatmul.mubr.msk.f32.vlgmr.msra.gmra.mxu1 %vm2422_vm3, %v2406_v15  ;;  %v4749_v15 = vld [vmem:[%s6592_s3 + $0x2a8] sm:$0xff] }
 0x7c4   : > { %5268 = vmatprep.mubr.msk.f32.mxu1 %vm5608_vm1, %v5607_v7  ;;  %5261 = vmatpush3.msra.mxu1 %v4723_v28 }
 0x7c5   : > { %5262 = vmatprep.subr.mxu1 %v5607_v7 }
 0x7c6   : > { %5263 = vmatpush3.msra.mxu1 %v4722_v30 }
 0x7c7   : > { %5264 = vmatprep.subr.mxu1 %v5607_v7 }
 0x7c8   : > { %5265 = vmatpush3.msra.mxu1 %v4721_v32 }
 0x7c9   : > { %5266 = vmatprep.subr.mxu1 %v5607_v7 }
 0x7ca   : > { %5267 = vmatpush3.msra.mxu1 %v4720_v34 }
 0x7cb   : > { %5282 = vmatprep.subr.mxu1 %v5607_v7 }
 0x883   : > { %v2492_v17 = vpop.f32.mrf.mxu1 }
 0x884   : > { %v2493_v18 = vadd.f32 %v4706_v16, %v2492_v17  ;;  %v4748_v16 = vld [vmem:[%s6592_s3 + $0x2a0] sm:$0xff]  ;;  %v4759_v17 = vld [vmem:[%s6592_s3 + $0x2f8] sm:$0xff] }
 0x885   : > { %v5237_v19 = vpop.f32.mrf.mxu1 }
 0x886   : > { %v6147_v20 = vadd.f32 %v2493_v18, %v6074_v42  ;;  %v4758_v18 = vld [vmem:[%s6592_s3 + $0x2f0] sm:$0xff]  ;;  %v4757_v19 = vld [vmem:[%s6592_s3 + $0x2e8] sm:$0xff] }
 0x888   : > { %v2501_v21 = vsel %vm412_vm0, %v6147_v20, 0.0 }
 0x889   : > { %2502 = vadd.xlane.f32.xlu0 %v2501_v21  ;;  %v4756_v21 = vld [vmem:[%s6592_s3 + $0x2e0] sm:$0xff] }
 0x912   : > { %v2503_v22 = vpop.xlane.xlu0 %2502 }
 0x913   : > { %v2504_v23 = vmul.f32 0.03125, %v2503_v22 }
 0x915   : > { %v2505_v24 = vsub.f32 %v6147_v20, %v2504_v23 }
 0x917   : > { %v2506_v25 = vmul.f32 %v2505_v24, %v2505_v24 }
 0x919   : > { %v2507_v26 = vsel %vm412_vm0, %v2506_v25, 0.0 }
 0x91a   : > { %2508 = vadd.xlane.f32.xlu1 %v2507_v26 }
 0x9a3   : > { %v2509_v35 = vpop.xlane.xlu1 %2508 }
 0x9a4   : > { %v2510_v36 = vmul.f32 0.03125, %v2509_v35 }
 0x9a6   : > { %v2511_v37 = vadd.f32 1e-05, %v2510_v36 }
 0x9a8   : > { %5523 = vrsqrt.f32 %v2511_v37 }
 0x9b5   : > { %v5524_v38 = vpop.eup %5523 }
 0x9b6   : > { %v2513_v40 = vmul.f32 %v5524_v38, %v2505_v24 }
 0x9b8   : > { %v2520_v42 = vmul.f32 %v4710_v39, %v2513_v40 }
 0x9ba   : > { %v6191_v43 = vadd.f32 %v4711_v41, %v2520_v42 }
 0x9bc   : > { %5247 = vmatmul.mubr.msk.f32.vlgmr.msra.gmra.mxu0 %vm412_vm0, %v6191_v43  ;;  %5269 = vmatmul.mubr.msk.f32.vlgmr.msra.gmra.mxu1 %vm412_vm0, %v6191_v43 }
 0x9bd   : > { %5250 = vmatpush3.msra.mxu0 %v4719_v44  ;;  %5283 = vmatpush3.msra.mxu1 %v4731_v45 }
 0x9be   : > { %5251 = vmatprep.subr.mxu0 %v5607_v7  ;;  %5284 = vmatprep.subr.mxu1 %v5607_v7 }
 0x9bf   : > { %5252 = vmatpush3.msra.mxu0 %v4718_v46  ;;  %5285 = vmatpush3.msra.mxu1 %v4730_v47 }
 0x9c0   : > { %5253 = vmatprep.subr.mxu0 %v5607_v7  ;;  %5286 = vmatprep.subr.mxu1 %v5607_v7 }
 0x9c1   : > { %5254 = vmatpush3.msra.mxu0 %v4717_v48  ;;  %5287 = vmatpush3.msra.mxu1 %v4729_v49 }
 0x9c2   : > { %5255 = vmatprep.subr.mxu0 %v5607_v7  ;;  %5288 = vmatprep.subr.mxu1 %v5607_v7 }
 0x9c3   : > { %5256 = vmatpush3.msra.mxu0 %v4716_v0  ;;  %5257 = vmatprep.mubr.msk.f32.mxu0 %vm5608_vm1, %v5607_v7 }
 0x9c4   : > { %5289 = vmatpush3.msra.mxu1 %v4728_v50  ;;  %5290 = vmatprep.mubr.msk.f32.mxu1 %vm5608_vm1, %v5607_v7 }
 0x9c5   : > { %5258 = vmatmul.mubr.msk.f32.vlgmr.msra.gmra.mxu0 %vm412_vm0, %v6191_v43  ;;  %5271 = vmatprep.subr.mxu0 %v5607_v7 }
 0x9c6   : > { %5291 = vmatmul.mubr.msk.f32.vlgmr.msra.gmra.mxu1 %vm412_vm0, %v6191_v43  ;;  %5304 = vmatprep.subr.mxu1 %v5607_v7 }
 0x9c7   : > { %5272 = vmatpush3.msra.mxu0 %v4727_v51  ;;  %5305 = vmatpush3.msra.mxu1 %v4739_v52 }
 0x9c8   : > { %5273 = vmatprep.subr.mxu0 %v5607_v7  ;;  %5306 = vmatprep.subr.mxu1 %v5607_v7 }
 0x9c9   : > { %5274 = vmatpush3.msra.mxu0 %v4726_v53  ;;  %5307 = vmatpush3.msra.mxu1 %v4738_v54 }
 0x9ca   : > { %5275 = vmatprep.subr.mxu0 %v5607_v7  ;;  %5308 = vmatprep.subr.mxu1 %v5607_v7 }
 0x9cb   : > { %5276 = vmatpush3.msra.mxu0 %v4725_v55  ;;  %5309 = vmatpush3.msra.mxu1 %v4737_v56 }
 0x9cc   : > { %5277 = vmatprep.subr.mxu0 %v5607_v7  ;;  %5310 = vmatprep.subr.mxu1 %v5607_v7 }
 0x9cd   : > { %5278 = vmatpush3.msra.mxu0 %v4724_v57  ;;  %5279 = vmatprep.mubr.msk.f32.mxu0 %vm5608_vm1, %v5607_v7 }
 0x9ce   : > { %5311 = vmatpush3.msra.mxu1 %v4736_v58  ;;  %5312 = vmatprep.mubr.msk.f32.mxu1 %vm5608_vm1, %v5607_v7 }
 0x9cf   : > { %5280 = vmatmul.mubr.msk.f32.vlgmr.msra.gmra.mxu0 %vm412_vm0, %v6191_v43  ;;  %5293 = vmatprep.subr.mxu0 %v5607_v7 }
 0x9d0   : > { %5313 = vmatmul.mubr.msk.f32.vlgmr.msra.gmra.mxu1 %vm412_vm0, %v6191_v43  ;;  %5326 = vmatprep.subr.mxu1 %v5607_v7 }
 0x9d1   : > { %5294 = vmatpush3.msra.mxu0 %v4735_v59  ;;  %5327 = vmatpush3.msra.mxu1 %v4747_v60 }
 0x9d2   : > { %5295 = vmatprep.subr.mxu0 %v5607_v7  ;;  %5328 = vmatprep.subr.mxu1 %v5607_v7 }
 0x9d3   : > { %5296 = vmatpush3.msra.mxu0 %v4734_v61  ;;  %5329 = vmatpush3.msra.mxu1 %v4746_v62 }
 0x9d4   : > { %5297 = vmatprep.subr.mxu0 %v5607_v7  ;;  %5330 = vmatprep.subr.mxu1 %v5607_v7 }
 0x9d5   : > { %5298 = vmatpush3.msra.mxu0 %v4733_v63  ;;  %5331 = vmatpush3.msra.mxu1 %v4745_v1 }
 0x9d6   : > { %5299 = vmatprep.subr.mxu0 %v5607_v7  ;;  %5332 = vmatprep.subr.mxu1 %v5607_v7 }
 0x9d7   : > { %5300 = vmatpush3.msra.mxu0 %v4732_v2  ;;  %5301 = vmatprep.mubr.msk.f32.mxu0 %vm5608_vm1, %v5607_v7 }
 0x9d8   : > { %5333 = vmatpush3.msra.mxu1 %v4744_v3  ;;  %5334 = vmatprep.mubr.msk.f32.mxu1 %vm5608_vm1, %v5607_v7 }
 0x9d9   : > { %5302 = vmatmul.mubr.msk.f32.vlgmr.msra.gmra.mxu0 %vm412_vm0, %v6191_v43  ;;  %5315 = vmatprep.subr.mxu0 %v5607_v7 }
 0x9da   : > { %5335 = vmatmul.mubr.msk.f32.vlgmr.msra.gmra.mxu1 %vm412_vm0, %v6191_v43  ;;  %5348 = vmatprep.subr.mxu1 %v5607_v7 }
 0x9db   : > { %5316 = vmatpush3.msra.mxu0 %v4743_v4  ;;  %5349 = vmatpush3.msra.mxu1 %v4755_v5 }
 0x9dc   : > { %5317 = vmatprep.subr.mxu0 %v5607_v7  ;;  %5350 = vmatprep.subr.mxu1 %v5607_v7 }
 0x9dd   : > { %5318 = vmatpush3.msra.mxu0 %v4742_v6  ;;  %5351 = vmatpush3.msra.mxu1 %v4754_v8 }
 0x9de   : > { %5319 = vmatprep.subr.mxu0 %v5607_v7  ;;  %5352 = vmatprep.subr.mxu1 %v5607_v7 }
 0x9df   : > { %5320 = vmatpush3.msra.mxu0 %v4741_v9  ;;  %5353 = vmatpush3.msra.mxu1 %v4753_v10 }
 0x9e0   : > { %5321 = vmatprep.subr.mxu0 %v5607_v7  ;;  %5354 = vmatprep.subr.mxu1 %v5607_v7 }
 0x9e1   : > { %5322 = vmatpush3.msra.mxu0 %v4740_v11  ;;  %5323 = vmatprep.mubr.msk.f32.mxu0 %vm5608_vm1, %v5607_v7 }
 0x9e2   : > { %5355 = vmatpush3.msra.mxu1 %v4752_v12  ;;  %5356 = vmatprep.mubr.msk.f32.mxu1 %vm5608_vm1, %v5607_v7 }
 0x9e3   : > { %5324 = vmatmul.mubr.msk.f32.vlgmr.msra.gmra.mxu0 %vm412_vm0, %v6191_v43  ;;  %5337 = vmatprep.subr.mxu0 %v5607_v7 }
 0x9e4   : > { %5357 = vmatmul.mubr.msk.f32.vlgmr.msra.gmra.mxu1 %vm412_vm0, %v6191_v43  ;;  %5338 = vmatpush3.msra.mxu0 %v4751_v13 }
 0x9e5   : > { %5339 = vmatprep.subr.mxu0 %v5607_v7  ;;  %5345 = vmatprep.mubr.msk.f32.mxu0 %vm5608_vm1, %v5607_v7 }
 0x9e6   : > { %5340 = vmatpush3.msra.mxu0 %v4750_v14  ;;  %5370 = vmatprep.subr.mxu1 %v5607_v7 }
 0x9e7   : > { %5341 = vmatprep.subr.mxu0 %v5607_v7  ;;  %5372 = vmatprep.mubr.msk.f32.mxu1 %vm5608_vm1, %v5607_v7 }
 0x9e8   : > { %5342 = vmatpush3.msra.mxu0 %v4749_v15 }
 0x9e9   : > { %5343 = vmatprep.subr.mxu0 %v5607_v7 }
 0x9ea   : > { %5344 = vmatpush3.msra.mxu0 %v4748_v16 }
 0x9eb   : > { %5346 = vmatmul.mubr.msk.f32.vlgmr.msra.gmra.mxu0 %vm412_vm0, %v6191_v43  ;;  %5359 = vmatprep.subr.mxu0 %v5607_v7 }
 0x9ec   : > { %5360 = vmatpush3.msra.mxu0 %v4759_v17  ;;  %5367 = vmatprep.mubr.msk.f32.mxu0 %vm5608_vm1, %v5607_v7 }
 0x9ed   : > { %5361 = vmatprep.subr.mxu0 %v5607_v7 }
 0x9ee   : > { %5362 = vmatpush3.msra.mxu0 %v4758_v18 }
 0x9ef   : > { %5363 = vmatprep.subr.mxu0 %v5607_v7 }
 0x9f0   : > { %5364 = vmatpush3.msra.mxu0 %v4757_v19 }
 0x9f1   : > { %5365 = vmatprep.subr.mxu0 %v5607_v7 }
 0x9f2   : > { %5366 = vmatpush3.msra.mxu0 %v4756_v21 }
 0x9f3   : > { %5368 = vmatmul.mubr.msk.f32.vlgmr.msra.gmra.mxu0 %vm412_vm0, %v6191_v43  ;;  %5380 = vmatprep.subr.mxu0 %v5607_v7 }
 0x9f4   : > { %5382 = vmatprep.mubr.msk.f32.mxu0 %vm5608_vm1, %v5607_v7 }
 0xa7c   : > { %v2646_v22 = vpop.f32.mrf.mxu0  ;;  %v2786_v23 = vpop.f32.mrf.mxu1 }
 0xa7e   : > { %v5248_v24 = vpop.f32.mrf.mxu0  ;;  %v5270_v25 = vpop.f32.mrf.mxu1 }
 0xa85   : > { %v2716_v26 = vpop.f32.mrf.mxu0 }
 0xa86   : > { %v2926_v27 = vpop.f32.mrf.mxu1 }
 0xa87   : > { %5371 = vmatpush3.xpose.msk.msra.mxu1 %vm1332_vm2, %v2926_v27  ;;  %v5259_v28 = vpop.f32.mrf.mxu0 }
 0xa88   : > { %v5292_v29 = vpop.f32.mrf.mxu1  ;;  %5375 = vmatprep.subr.mxu1 %v5607_v7 }
 0xa8a   : > { %5373 = vmatmul.mubr.msk.f32.vlgmr.msra.gmra.mxu1 %vm1332_vm2, %v2646_v22 }
 0xa8b   : > { %5377 = vmatprep.mubr.msk.f32.mxu1 %vm5608_vm1, %v5607_v7 }
 0xa8f   : > { %v2856_v30 = vpop.f32.mrf.mxu0 }
 0xa90   : > { %v3066_v31 = vpop.f32.mrf.mxu1 }
 0xa91   : > { %5381 = vmatpush3.xpose.msk.msra.mxu0 %vm1332_vm2, %v3066_v31  ;;  %v5281_v32 = vpop.f32.mrf.mxu0 }
 0xa92   : > { %v5314_v33 = vpop.f32.mrf.mxu1  ;;  %5390 = vmatprep.subr.mxu0 %v5607_v7  ;;  %v4784_v32 = vld [vmem:[%s6593_s4 + $0x20] sm:$0xff] }
 0xa93   : > { %v4785_v33 = vld [vmem:[%s6593_s4 + $0x28] sm:$0xff] }
 0xa94   : > { %5383 = vmatmul.mubr.msk.f32.vlgmr.msra.gmra.mxu0 %vm1332_vm2, %v2786_v23 }
 0xa95   : > { %5392 = vmatprep.mubr.msk.f32.mxu0 %vm5608_vm1, %v5607_v7 }
 0xa99   : > { %v2996_v34 = vpop.f32.mrf.mxu0 }
 0xa9a   : > { %v3206_v35 = vpop.f32.mrf.mxu1  ;;  %5376 = vmatpush3.xpose.msk.msra.mxu1 %vm1332_vm2, %v2996_v34  ;;  %v4786_v34 = vld [vmem:[%s6593_s4 + $0x30] sm:$0xff] }
 0xa9b   : > { %5391 = vmatpush3.msra.mxu0 %v3206_v35  ;;  %v5303_v36 = vpop.f32.mrf.mxu0  ;;  %5385 = vmatprep.subr.mxu1 %v5607_v7 }
 0xa9c   : > { %v5336_v37 = vpop.f32.mrf.mxu1  ;;  %5400 = vmatprep.subr.mxu0 %v5607_v7 }
 0xa9d   : > { %5378 = vmatmul.mubr.msk.f32.vlgmr.msra.gmra.mxu1 %vm1332_vm2, %v2716_v26 }
 0xa9e   : > { %5387 = vmatprep.mubr.msk.f32.mxu1 %vm5608_vm1, %v5607_v7 }
 0xaa3   : > { %v3136_v38 = vpop.f32.mrf.mxu0 }
 0xaa4   : > { %v6417_v39 = vpop.f32.mrf.mxu1  ;;  %5386 = vmatpush3.xpose.msk.msra.mxu1 %vm1332_vm2, %v3136_v38 }
 0xaa5   : > { %v5325_v40 = vpop.f32.mrf.mxu0  ;;  %5395 = vmatprep.subr.mxu1 %v5607_v7 }
 0xaa6   : > { %v5358_v41 = vpop.f32.mrf.mxu1 }
 0xaa7   : > { %5388 = vmatmul.mubr.msk.f32.vlgmr.msra.gmra.mxu1 %vm1332_vm2, %v2856_v30 }
 0xaa8   : > { %5397 = vmatprep.mubr.msk.f32.mxu1 %vm5608_vm1, %v5607_v7 }
 0xaab   : > { %v3276_v42 = vpop.f32.mrf.mxu0 }
 0xaac   : > { %5396 = vmatpush3.msra.mxu1 %v3276_v42 }
 0xaad   : > { %v5347_v43 = vpop.f32.mrf.mxu0  ;;  %5405 = vmatprep.subr.mxu1 %v5607_v7 }
 0xab3   : > { %v6425_v44 = vpop.f32.mrf.mxu0 }
 0xab5   : > { %v5369_v45 = vpop.f32.mrf.mxu0 }
 0xb4a   : > { %v3492_v46 = vpop.f32.mrf.mxu1 }
 0xb4b   : > { %v3724_v47 = vmul.f32 0.35355338, %v3492_v46 }
 0xb4c   : > { %v5374_v48 = vpop.f32.mrf.mxu1 }
 0xb4d   : > { %v3728_v49 = vsel %vm1332_vm2, %v3724_v47, -inf }
 0xb4e   : > { %3729 = vmax.xlane.f32.xlu0 %v3728_v49 }
 0xb54   : > { %v3644_v0 = vpop.f32.mrf.mxu0 }
 0xb55   : > { %v3726_v50 = vmul.f32 0.35355338, %v3644_v0 }
 0xb56   : > { %v5384_v51 = vpop.f32.mrf.mxu0 }
 0xb57   : > { %v3734_v52 = vsel %vm1332_vm2, %v3726_v50, -inf }
 0xb58   : > { %3735 = vmax.xlane.f32.xlu0 %v3734_v52 }
 0xb5d   : > { %v3568_v53 = vpop.f32.mrf.mxu1 }
 0xb5e   : > { %v3725_v54 = vmul.f32 0.35355338, %v3568_v53 }
 0xb5f   : > { %v5379_v55 = vpop.f32.mrf.mxu1 }
 0xb60   : > { %v3731_v56 = vsel %vm1332_vm2, %v3725_v54, -inf }
 0xb61   : > { %3732 = vmax.xlane.f32.xlu1 %v3731_v56  ;;  %v4793_v56 = vld [vmem:[%s6594_s5 + $0x1] ss:$0 sm:$0xff] }
 0xb67   : > { %v3720_v57 = vpop.f32.mrf.mxu1 }
 0xb68   : > { %v3727_v58 = vmul.f32 0.35355338, %v3720_v57 }
 0xb69   : > { %v5389_v59 = vpop.f32.mrf.mxu1 }
 0xb6a   : > { %v3737_v60 = vsel %vm1332_vm2, %v3727_v58, -inf }
 0xb6b   : > { %3738 = vmax.xlane.f32.xlu1 %v3737_v60 }
 0xbd7   : > { %v3730_v61 = vpop.xlane.xlu0 %3729 }
 0xbd8   : > { %v3740_v62 = vsub.f32 %v3724_v47, %v3730_v61 }
 0xbda   : > { %v3744_v63 = vmul.f32 1.442695, %v3740_v62 }
 0xbdc   : > { %5525 = vpow2.f32 %v3744_v63 }
 0xbe1   : > { %v3736_v1 = vpop.xlane.xlu0 %3735 }
 0xbe2   : > { %v3742_v2 = vsub.f32 %v3726_v50, %v3736_v1 }
 0xbe4   : > { %v3748_v3 = vmul.f32 1.442695, %v3742_v2 }
 0xbe6   : > { %5527 = vpow2.f32 %v3748_v3 }
 0xbe9   : > { %v5526_v4 = vpop.eup %5525 }
 0xbea   : > { %v3733_v5 = vpop.xlane.xlu1 %3732  ;;  %v3752_v6 = vsel %vm1332_vm2, %v5526_v4, 0.0 }
 0xbeb   : > { %v3741_v8 = vsub.f32 %v3725_v54, %v3733_v5  ;;  %3753 = vadd.xlane.f32.xlu0 %v3752_v6  ;;  %v4799_v5 = vld [vmem:[%s6597_s8 + $0x28] sm:$0xff]  ;;  %v4798_v6 = vld [vmem:[%s6597_s8 + $0x20] sm:$0xff] }
 0xbed   : > { %v3746_v9 = vmul.f32 1.442695, %v3741_v8 }
 0xbef   : > { %5529 = vpow2.f32 %v3746_v9 }
 0xbf3   : > { %v5528_v10 = vpop.eup %5527 }
 0xbf4   : > { %v3739_v11 = vpop.xlane.xlu1 %3738  ;;  %v3758_v12 = vsel %vm1332_vm2, %v5528_v10, 0.0 }
 0xbf5   : > { %v3743_v13 = vsub.f32 %v3727_v58, %v3739_v11  ;;  %3759 = vadd.xlane.f32.xlu0 %v3758_v12  ;;  %v4796_v12 = vld [vmem:[%s6595_s6 + $0x1] ss:$0 sm:$0xff] }
 0xbf7   : > { %v3750_v14 = vmul.f32 1.442695, %v3743_v13 }
 0xbf9   : > { %5531 = vpow2.f32 %v3750_v14  ;;  %v4797_v14 = vld [vmem:[%s6596_s7 + $0x1] ss:$0 sm:$0xff] }
 0xbfc   : > { %v5530_v15 = vpop.eup %5529 }
 0xbfd   : > { %v3755_v16 = vsel %vm1332_vm2, %v5530_v15, 0.0 }
 0xbfe   : > { %3756 = vadd.xlane.f32.xlu1 %v3755_v16 }
 0xc06   : > { %v5532_v17 = vpop.eup %5531 }
 0xc07   : > { %v3761_v18 = vsel %vm1332_vm2, %v5532_v17, 0.0 }
 0xc08   : > { %3762 = vadd.xlane.f32.xlu1 %v3761_v18  ;;  %v4811_v18 = vld [vmem:[%s6599_s10 + $0x70] sm:$0xff] }
 0xc74   : > { %v3754_v19 = vpop.xlane.xlu0 %3753 }
 0xc75   : > { %5533 = vrcp.f32 %v3754_v19  ;;  %v4810_v19 = vld [vmem:[%s6599_s10 + $0x68] sm:$0xff] }
 0xc7e   : > { %v3760_v21 = vpop.xlane.xlu0 %3759 }
 0xc7f   : > { %5535 = vrcp.f32 %v3760_v21  ;;  %v4809_v21 = vld [vmem:[%s6599_s10 + $0x60] sm:$0xff] }
 0xc82   : > { %v5534_v22 = vpop.eup %5533 }
 0xc83   : > { %v3768_v23 = vmul.f32 %v5534_v22, %v5526_v4  ;;  %v4801_v4 = vld [vmem:[%s6597_s8 + $0x38] sm:$0xff] }
 0xc84   : > { %v4808_v22 = vld [vmem:[%s6599_s10 + $0x58] sm:$0xff] }
 0xc85   : > { %5393 = vmatmul.mubr.msk.f32.vlgmr.msra.gmra.mxu0 %vm1332_vm2, %v3768_v23  ;;  %v4807_v23 = vld [vmem:[%s6599_s10 + $0x50] sm:$0xff] }
 0xc86   : > { %5401 = vmatpush3.msra.mxu0 %v6417_v39  ;;  %5402 = vmatprep.mubr.msk.f32.mxu0 %vm5608_vm1, %v5607_v7  ;;  %v4787_v39 = vld [vmem:[%s6593_s4 + $0x38] sm:$0xff] }
 0xc87   : > { %v3757_v24 = vpop.xlane.xlu1 %3756  ;;  %5410 = vmatprep.subr.mxu0 %v5607_v7 }
 0xc88   : > { %5537 = vrcp.f32 %v3757_v24  ;;  %v4806_v24 = vld [vmem:[%s6599_s10 + $0x48] sm:$0xff] }
 0xc8c   : > { %v5536_v25 = vpop.eup %5535 }
 0xc8d   : > { %v3770_v26 = vmul.f32 %v5536_v25, %v5528_v10  ;;  %v4805_v25 = vld [vmem:[%s6599_s10 + $0x40] sm:$0xff] }
 0xc8f   : > { %5403 = vmatmul.mubr.msk.f32.vlgmr.msra.gmra.mxu0 %vm1332_vm2, %v3770_v26  ;;  %v4803_v26 = vld [vmem:[%s6598_s9 + $0x1] ss:$0 sm:$0xff] }
 0xc90   : > { %5412 = vmatprep.mubr.msk.f32.mxu0 %vm5608_vm1, %v5607_v7  ;;  %5411 = vmatpush3.msra.mxu0 %v4784_v32 }
 0xc91   : > { %v3763_v27 = vpop.xlane.xlu1 %3762  ;;  %5420 = vmatprep.subr.mxu0 %v5607_v7 }
 0xc92   : > { %5539 = vrcp.f32 %v3763_v27 }
 0xc95   : > { %v5538_v28 = vpop.eup %5537 }
 0xc96   : > { %v3769_v29 = vmul.f32 %v5538_v28, %v5530_v15 }
 0xc98   : > { %5398 = vmatmul.mubr.msk.f32.vlgmr.msra.gmra.mxu1 %vm1332_vm2, %v3769_v29 }
 0xc99   : > { %5406 = vmatpush3.msra.mxu1 %v6425_v44  ;;  %5407 = vmatprep.mubr.msk.f32.mxu1 %vm5608_vm1, %v5607_v7 }
 0xc9a   : > { %5415 = vmatprep.subr.mxu1 %v5607_v7 }
 0xc9f   : > { %v5540_v30 = vpop.eup %5539 }
 0xca0   : > { %v3771_v31 = vmul.f32 %v5540_v30, %v5532_v17  ;;  %v4812_v17 = vld [vmem:[%s6599_s10 + $0x78] sm:$0xff] }
 0xca2   : > { %5408 = vmatmul.mubr.msk.f32.vlgmr.msra.gmra.mxu1 %vm1332_vm2, %v3771_v31 }
 0xca3   : > { %5417 = vmatprep.mubr.msk.f32.mxu1 %vm5608_vm1, %v5607_v7  ;;  %5416 = vmatpush3.msra.mxu1 %v4785_v33 }
 0xca4   : > { %5425 = vmatprep.subr.mxu1 %v5607_v7 }
 0xd45   : > { %v3841_v35 = vpop.f32.mrf.mxu0 }
 0xd46   : > { %5413 = vmatmul.mubr.msk.f32.vlgmr.msra.gmra.mxu0 %vm1332_vm2, %v3841_v35 }
 0xd47   : > { %v5394_v36 = vpop.f32.mrf.mxu0  ;;  %5421 = vmatpush3.msra.mxu0 %v4786_v34  ;;  %5422 = vmatprep.mubr.msk.f32.mxu0 %vm5608_vm1, %v5607_v7 }
 0xd48   : > { %5430 = vmatprep.subr.mxu0 %v5607_v7 }
 0xd4f   : > { %v3987_v37 = vpop.f32.mrf.mxu0 }
 0xd50   : > { %5423 = vmatmul.mubr.msk.f32.vlgmr.msra.gmra.mxu0 %vm1332_vm2, %v3987_v37 }
 0xd51   : > { %v5404_v38 = vpop.f32.mrf.mxu0  ;;  %5438 = vmatprep.mubr.msk.f32.mxu0 %vm5608_vm1, %v5607_v7  ;;  %5431 = vmatpush3.msra.mxu0 %v4801_v4 }
 0xd52   : > { %5432 = vmatprep.subr.mxu0 %v5607_v7 }
 0xd58   : > { %v3914_v40 = vpop.f32.mrf.mxu1 }
 0xd59   : > { %5418 = vmatmul.mubr.msk.f32.vlgmr.msra.gmra.mxu1 %vm1332_vm2, %v3914_v40 }
 0xd5a   : > { %v5399_v41 = vpop.f32.mrf.mxu1  ;;  %5426 = vmatpush3.msra.mxu1 %v4787_v39  ;;  %5427 = vmatprep.mubr.msk.f32.mxu1 %vm5608_vm1, %v5607_v7 }
 0xd5b   : > { %5441 = vmatprep.subr.mxu1 %v5607_v7 }
 0xd62   : > { %v4060_v42 = vpop.f32.mrf.mxu1 }
 0xd63   : > { %5428 = vmatmul.mubr.msk.f32.vlgmr.msra.gmra.mxu1 %vm1332_vm2, %v4060_v42 }
 0xd64   : > { %v5409_v43 = vpop.f32.mrf.mxu1  ;;  %5457 = vmatprep.mubr.msk.f32.mxu1 %vm5608_vm1, %v5607_v7  ;;  %5442 = vmatpush3.msra.mxu1 %v4812_v17 }
 0xd65   : > { %5443 = vmatprep.subr.mxu1 %v5607_v7 }
 0xd66   : > { %5444 = vmatpush3.msra.mxu1 %v4811_v18 }
 0xd67   : > { %5445 = vmatprep.subr.mxu1 %v5607_v7 }
 0xd68   : > { %5446 = vmatpush3.msra.mxu1 %v4810_v19 }
 0xd69   : > { %5447 = vmatprep.subr.mxu1 %v5607_v7 }
 0xd6a   : > { %5448 = vmatpush3.msra.mxu1 %v4809_v21 }
 0xd6b   : > { %5449 = vmatprep.subr.mxu1 %v5607_v7 }
 0xd6c   : > { %5450 = vmatpush3.msra.mxu1 %v4808_v22 }
 0xd6d   : > { %5451 = vmatprep.subr.mxu1 %v5607_v7 }
 0xd6e   : > { %5452 = vmatpush3.msra.mxu1 %v4807_v23 }
 0xd6f   : > { %5453 = vmatprep.subr.mxu1 %v5607_v7 }
 0xd70   : > { %5454 = vmatpush3.msra.mxu1 %v4806_v24 }
 0xd71   : > { %5455 = vmatprep.subr.mxu1 %v5607_v7 }
 0xd72   : > { %5456 = vmatpush3.msra.mxu1 %v4805_v25 }
 0xe06   : > { %v4138_v44 = vpop.f32.mrf.mxu0 }
 0xe07   : > { %v4361_v50 = vsel %vm412_vm0, %v4138_v44, 0.0 }
 0xe08   : > { %v5414_v45 = vpop.f32.mrf.mxu0 }
 0xe10   : > { %v4284_v46 = vpop.f32.mrf.mxu0 }
 0xe11   : > { %v4364_v52 = vsel %vm412_vm0, %v4284_v46, 0.0 }
 0xe12   : > { %v5424_v47 = vpop.f32.mrf.mxu0 }
 0xe19   : > { %v4211_v48 = vpop.f32.mrf.mxu1 }
 0xe1a   : > { %v4362_v0 = vsel %vm412_vm0, %v4211_v48, 0.0 }
 0xe1b   : > { %v5419_v49 = vpop.f32.mrf.mxu1  ;;  %v4363_v51 = vadd.f32 %v4362_v0, %v4361_v50 }
 0xe1d   : > { %v4365_v54 = vadd.f32 %v4364_v52, %v4363_v51 }
 0xe23   : > { %v4357_v53 = vpop.f32.mrf.mxu1 }
 0xe24   : > { %v4366_v55 = vsel %vm412_vm0, %v4357_v53, 0.0 }
 0xe25   : > { %v4367_v57 = vadd.f32 %v4366_v55, %v4365_v54  ;;  %v5429_v58 = vpop.f32.mrf.mxu1 }
 0xe27   : > { %v4376_v59 = vadd.f32 %v4793_v56, %v4367_v57 }
 0xe29   : > { %v6487_v60 = vadd.f32 %v4376_v59, %v6147_v20  ;;  %v4800_v20 = vld [vmem:[%s6597_s8 + $0x30] sm:$0xff] }
 0xe2a   : > { %5433 = vmatpush3.msra.mxu0 %v4800_v20 }
 0xe2b   : > { %v4382_v61 = vsel %vm412_vm0, %v6487_v60, 0.0  ;;  %5434 = vmatprep.subr.mxu0 %v5607_v7 }
 0xe2c   : > { %4383 = vadd.xlane.f32.xlu0 %v4382_v61  ;;  %5435 = vmatpush3.msra.mxu0 %v4799_v5 }
 0xe2d   : > { %5436 = vmatprep.subr.mxu0 %v5607_v7  ;;  %v4814_v7 = vld [vmem:[%s6600_s11 + $0x1] ss:$0 sm:$0xff] }
 0xe2e   : > { %5437 = vmatpush3.msra.mxu0 %v4798_v6 }
 0xeb5   : > { %v4384_v62 = vpop.xlane.xlu0 %4383 }
 0xeb6   : > { %v4385_v63 = vmul.f32 0.03125, %v4384_v62 }
 0xeb8   : > { %v4386_v1 = vsub.f32 %v6487_v60, %v4385_v63 }
 0xeba   : > { %v4387_v2 = vmul.f32 %v4386_v1, %v4386_v1 }
 0xebc   : > { %v4388_v3 = vsel %vm412_vm0, %v4387_v2, 0.0 }
 0xebd   : > { %4389 = vadd.xlane.f32.xlu1 %v4388_v3 }
 0xf46   : > { %v4390_v8 = vpop.xlane.xlu1 %4389 }
 0xf47   : > { %v4391_v9 = vmul.f32 0.03125, %v4390_v8 }
 0xf49   : > { %v4392_v10 = vadd.f32 1e-05, %v4391_v9 }
 0xf4b   : > { %5541 = vrsqrt.f32 %v4392_v10 }
 0xf58   : > { %v5542_v11 = vpop.eup %5541 }
 0xf59   : > { %v4394_v13 = vmul.f32 %v5542_v11, %v4386_v1 }
 0xf5b   : > { %v4401_v15 = vmul.f32 %v4796_v12, %v4394_v13 }
 0xf5d   : > { %v4408_v16 = vadd.f32 %v4797_v14, %v4401_v15 }
 0xf5f   : > { %5439 = vmatmul.mubr.msk.f32.vlgmr.msra.gmra.mxu0 %vm412_vm0, %v4408_v16 }
0x101f   : > { %v4491_v27 = vpop.f32.mrf.mxu0 }
0x1020   : > { %v4492_v28 = vadd.f32 %v4803_v26, %v4491_v27 }
0x1021   : > { %v5440_v29 = vpop.f32.mrf.mxu0 }
0x1022   : > { %v4496_v30 = vmul.f32 0.70710677, %v4492_v28  ;;  %v4495_v32 = vmul.f32 0.5, %v4492_v28 }
0x1024   : > { %5543 = verf.f32 %v4496_v30 }
0x1031   : > { %v5544_v31 = vpop.eup %5543 }
0x1032   : > { %v4498_v33 = vadd.f32 1.0, %v5544_v31 }
0x1034   : > { %v4499_v34 = vmul.f32 %v4498_v33, %v4495_v32 }
0x1036   : > { %5458 = vmatmul.mubr.msk.f32.vlgmr.msra.gmra.mxu1 %vm2422_vm3, %v4499_v34 }
0x10f6   : > { %v4586_v35 = vpop.f32.mrf.mxu1 }
0x10f7   : > { %v4587_v36 = vadd.f32 %v4814_v7, %v4586_v35 }
0x10f8   : > { %v5459_v37 = vpop.f32.mrf.mxu1 }
0x10f9   : > { %v4590_v38 = vadd.f32 %v4587_v36, %v6487_v60 }
0x10fb   : > { %4591 = vst.msk [vmem:[%s404_s19] sm:$0xff] %vm412_vm0, %v4590_v38 }
0x10fc   : > { %5558 = shalt.err (!%p5555_p3)
}
0x10fd   : > { %s5559_s17 = scalar_lea.hbm %s4604_s0, 128  ;;  %s5563_s19 = scalar_lea.hbm %s6601_s12, 256 }
0x10fe   : > { %p5560_p4 = scmp.ne.s32.totalorder %s4604_s0, %s5559_s17  ;;  %p5564_p9 = scmp.lt.s32.totalorder %s4604_s0, %s6601_s12 }
0x10ff   : > { %p5565_p10 = scmp.lt.s32.totalorder %s5563_s19, %s5559_s17 }
0x1100   : > { %p5561_p7 = pnand %p5560_p4, %p5713_p5 }
0x1101   : > { %p5566_p11 = por %p5565_p10, %p5564_p9 }
0x1102   : > { %p5562_p8 = pneg %p5561_p7 }
0x1104   : > { %p5567_p12 = pnand %p5566_p11, %p5562_p8 }
0x1106   : > { %5570 = shalt.err (!%p5567_p12)
}
0x1107   : > { %5460 = dma.vmem_to_hbm [thread:$0]  (%p5713_p5), %s4607_s20, 128, %s4604_s0, %s4593_s1  }
0x1108 PF: > { %p5466_p13 = scmp.ge.s32.totalorder %s5605_s24, 2  ;;  %s4618_s2 = sand.u32 1, %s5593_s21  }
0x1109   : > { %s4619_s25 = scalar_lea.sflag [#allocation3], %s4618_s2 }
0x110a   : > { %p5463_p0 = pnand %p5466_p13, %p5717_p6 }
0x110c   : > { %p5464_p1 = pneg %p5463_p0 }
0x110e   : > { %5588 = dma.done.wait (%p5464_p1), %s4619_s25, 128  }
0x110f   : > { %5590 = vsyncadd (%p5464_p1), %s4619_s25, 4294967168  ;;  %p22_p2 = scmp.ge.s32.totalorder %s5700_s27, 4   ;;  %s6610_s21 = smov %s5597_s22 }
0x1110   : > { %s6611_s22 = smov %s5601_s23  ;;  %s6612_s23 = smov %s5711_s30 }
0x1111   : > { %s6613_s24 = smov %s5700_s27  ;;  %24 = sbr.rel (!%p22_p2) target bundleno = 7 (0x7), region = 114 }
0x1116   :  { %4624 = vsyncpa [#allocation3], 1 }
0x1117   :  { %4626 = vsyncpa [#allocation3 + $0x1], 1 }

</bundles_post_ra>
